<compile_context>
chip_gen: v5e
topology: v5e:2x2
jax: 0.10.0
libtpu: 0.0.40
codegen_flags: <defaults>
</compile_context>

<pallas_src>
import math

import jax
import jax.numpy as jnp
from jax.experimental import pallas as pl
from jax.experimental.pallas import tpu as pltpu


# ---------------------------------------------------------------------------
# Fused forward kernel (factory closes over the static architecture)
# ---------------------------------------------------------------------------

def _make_kernel(conv_shapes, num_dense, H, W, C_last):
    HW = H * W
    num_convs = len(conv_shapes)

    def kernel(*refs):
        x_ref = refs[0]
        conv_refs = refs[1:1 + 2 * num_convs]
        dense_refs = refs[1 + 2 * num_convs:1 + 2 * num_convs + 2 * num_dense]
        o_ref = refs[1 + 2 * num_convs + 2 * num_dense]

        def shifted(v, dh, dw):
            # y[i] = v[(i + dh*W + dw) mod HW].  Wrapped (out-of-image) lanes are
            # neutralised by the zeros pre-multiplied into the weight rows / W1e rows.
            s = (-(dh * W + dw)) % HW
            return pltpu.roll(v, s, axis=1) if s else v

        # CutChannels was folded into the input BlockSpec: x_ref is channel 0 only,
        # already lane-dense (tb, H*W).
        chans = [x_ref[...]]

        acc_d1 = None                              # dense-1 accumulator (tb, D1)

        # Conv layers: 3x3 'same' conv + bias + ReLU.  Every tap = one XLU lane roll
        # + one VPU multiply-add against a mask-premultiplied (1, HW) weight row.
        for li, (cin, cout) in enumerate(conv_shapes):
            wm_ref = conv_refs[2 * li]             # (cout*cin*9, HW) VMEM, weight*mask
            b_ref = conv_refs[2 * li + 1]          # (cout,)          SMEM
            last = li == num_convs - 1
            new_chans = []
            for co in range(cout):
                acc = None
                for ci in range(cin):
                    xc = chans[ci]
                    for kh in range(3):
                        for kw in range(3):
                            r = (co * cin + ci) * 9 + kh * 3 + kw
                            term = shifted(xc, kh - 1, kw - 1) * wm_ref[r:r + 1, :]
                            acc = term if acc is None else acc + term
                y = jnp.maximum(acc + b_ref[co], 0.0)
                if not last:
                    new_chans.append(y)
                else:
                    # Fused MaxPool(2) + Flatten + dense-1 partial: pool in place with
                    # two lane rolls (values at odd-h/odd-w lanes are finite garbage
                    # that multiplies exactly-zero rows of W1e), then one MXU matmul.
                    # The channel slab dies immediately -> peak live set ~3 slabs.
                    rmax = jnp.maximum(y, shifted(y, 1, 0))
                    pooled = jnp.maximum(rmax, shifted(rmax, 0, 1))
                    part = jnp.dot(pooled, dense_refs[0][co],
                                   preferred_element_type=jnp.float32)
                    acc_d1 = part if acc_d1 is None else acc_d1 + part
            chans = new_chans

        # Dense layers (weights resident in VMEM).
        h = jnp.maximum(acc_d1 + dense_refs[1][...], 0.0)          # dense-1 bias+ReLU
        for di in range(1, num_dense):
            wd = dense_refs[2 * di][...]
            bd = dense_refs[2 * di + 1][...]
            h = jnp.maximum(
                jnp.dot(h, wd, preferred_element_type=jnp.float32) + bd, 0.0)
        o_ref[...] = h.astype(o_ref.dtype)

    return kernel


# ---------------------------------------------------------------------------
# Wrapper: builds specs, mask-premultiplied conv weights, expanded dense-1 weight
# ---------------------------------------------------------------------------

def _pick_batch_tile(N, batch_tile):
    batch_tile = max(8, (batch_tile // 8) * 8)
    if N <= batch_tile:
        if N >= 16:
            # v7x has 2 TensorCores: give the "parallel" batch axis >= 2 grid steps.
            half = -(-N // 2)
            return min(batch_tile, -(-half // 8) * 8)
        return N                                   # block == full batch dim
    return batch_tile


def simple_classifier_forward(x, params, *, batch_tile=64):
    x = x.astype(jnp.float32)
    N, C_in, H, W = x.shape
    HW = H * W

    conv_blocks = params["conv_blocks"]
    dense = params["dense"]
    # TODO(synk): the fused kernel handles the single-ConvBlock configuration this module
    # instance produces (16x16 input, conv_stop_size=64); deeper conv stacks would need an
    # intermediate pooled re-tiling inside the kernel.
    assert len(conv_blocks) == 1, "fused kernel supports exactly one ConvBlock"
    convs = conv_blocks[0]
    assert len(convs) >= 1

    conv_shapes = []
    for Wc, _ in convs:
        assert Wc.shape[2:] == (3, 3)
        conv_shapes.append((Wc.shape[1], Wc.shape[0]))     # (cin, cout)
    C_last = conv_shapes[-1][1]
    Hp, Wp = H // 2, W // 2
    num_dense = len(dense)

    # 'same'-padding edge masks over the flattened (h*W + w) lane axis, one per tap.
    ii = jnp.arange(HW)
    hh, ww = ii // W, ii % W
    masks = jnp.stack([
        ((hh + kh - 1 >= 0) & (hh + kh - 1 < H) &
         (ww + kw - 1 >= 0) & (ww + kw - 1 < W)).astype(jnp.float32)
        for kh in range(3) for kw in range(3)])            # (9, HW)

    tb = _pick_batch_tile(N, batch_tile)
    grid = (pl.cdiv(N, tb),)

    smem = pl.BlockSpec(memory_space=pltpu.MemorySpace.SMEM)
    vmem = pl.BlockSpec(memory_space=pltpu.MemorySpace.VMEM)

    # CutChannels via the index_map on a lane-dense (N, C*HW) view: block column 0 is
    # exactly channel 0 and is the only block ever DMA'd (contiguous burst).
    x_flat = x.reshape(N, C_in * HW)
    in_specs = [pl.BlockSpec((tb, HW), lambda i: (i, 0))]

    conv_inputs = []
    for Wc, bc in convs:
        cout, cin = Wc.shape[0], Wc.shape[1]
        wm = (Wc.reshape(cout * cin, 9, 1).astype(jnp.float32) * masks[None, :, :])
        conv_inputs += [wm.reshape(cout * cin * 9, HW), bc.astype(jnp.float32)]
        in_specs += [vmem, smem]

    # Pre-expand dense-1 weight onto the pooled-in-place lane layout: nonzero rows only
    # at even-h/even-w lane positions of each channel slab, zeros elsewhere.
    W1, b1 = dense[0]
    assert W1.shape[0] == C_last * Hp * Wp
    D1 = W1.shape[1]
    W1e = (jnp.zeros((C_last, H, W, D1), jnp.float32)
           .at[:, 0:H:2, 0:W:2, :]
           .set(W1.reshape(C_last, Hp, Wp, D1).astype(jnp.float32))
           .reshape(C_last, HW, D1))
    dense_inputs = [W1e, b1.astype(jnp.float32)]
    in_specs += [vmem, vmem]
    for Wl, bl in dense[1:]:
        dense_inputs += [Wl.astype(jnp.float32), bl.astype(jnp.float32)]
        in_specs += [vmem, vmem]

    D_out = dense[-1][0].shape[1]
    out_specs = pl.BlockSpec((tb, D_out), lambda i: (i, 0))

    # Advisory cost estimate for the XLA scheduler.
    conv_flops = sum(2 * co * ci * 9 * HW for ci, co in conv_shapes)
    dense_flops = 2 * C_last * HW * D1 + sum(
        2 * Wl.shape[0] * Wl.shape[1] for Wl, _ in dense[1:])
    flops = N * (conv_flops + dense_flops)
    w_bytes = 4 * sum(int(a.size) for a in conv_inputs + dense_inputs)
    bytes_accessed = N * HW * 4 + w_bytes + N * D_out * 4

    kernel = _make_kernel(conv_shapes, num_dense, H, W, C_last)

    fwd = pl.pallas_call(
        kernel,
        out_shape=jax.ShapeDtypeStruct((N, D_out), jnp.float32),
        grid=grid,
        in_specs=in_specs,
        out_specs=out_specs,
        compiler_params=pltpu.CompilerParams(
            dimension_semantics=("parallel",),          # shard batch tiles across TCs
            vmem_limit_bytes=32 * 1024 * 1024),         # safe on v7x's 64 MiB VMEM
        cost_estimate=pl.CostEstimate(
            flops=flops, transcendentals=0, bytes_accessed=bytes_accessed),
    )
    return fwd(x_flat, *conv_inputs, *dense_inputs)


# ---------------------------------------------------------------------------
# Parameter construction (mirrors SimpleClassifier.__init__ shape logic)
# ---------------------------------------------------------------------------

def build_params(key, input_shape=(16, 16), conv_stop_size=64,
                 count_dense_layers=2, conv_layers_per_block=2):
    params = {"conv_blocks": [], "dense": []}
    channels = 1
    h, w = input_shape
    pixels = h * w
    while pixels > conv_stop_size:
        out_channels = channels * 2              # 'double' channel progression
        convs = []
        cin = channels
        for _ in range(conv_layers_per_block):
            key, k1, k2 = jax.random.split(key, 3)
            Wc = 0.1 * jax.random.normal(k1, (out_channels, cin, 3, 3), jnp.float32)
            bc = 0.01 * jax.random.normal(k2, (out_channels,), jnp.float32)
            convs.append((Wc, bc))
            cin = out_channels
        params["conv_blocks"].append(convs)
        h, w = h // 2, w // 2                    # 'same' convs, then 2x2 pool
        channels = out_channels
        pixels = h * w

    in_size = pixels * channels
    factor = in_size ** (1.0 / count_dense_layers)
    dense_sizes = []
    for _ in range(count_dense_layers - 1):
        out_size = int(math.ceil(in_size / factor))
        dense_sizes.append((in_size, out_size))
        in_size = out_size
    dense_sizes.append((in_size, 2))
    for din, dout in dense_sizes:
        key, k1, k2 = jax.random.split(key, 3)
        Wl = jax.random.normal(k1, (din, dout), jnp.float32) / math.sqrt(din)
        bl = 0.01 * jax.random.normal(k2, (1, dout), jnp.float32)
        params["dense"].append((Wl, bl))
    return params


# ---------------------------------------------------------------------------
# Pure-JAX (non-Pallas) reference for self-checking
# ---------------------------------------------------------------------------

def reference_forward(x, params):
    x = x[:, 0:1].astype(jnp.float32)                      # CutChannels
    for convs in params["conv_blocks"]:
        for Wc, bc in convs:
            N, Cin, H, Wd = x.shape
            Cout = Wc.shape[0]
            xp = jnp.pad(x, ((0, 0), (0, 0), (1, 1), (1, 1)))
            outs = []
            for co in range(Cout):
                acc = jnp.zeros((N, H, Wd), jnp.float32)
                for ci in range(Cin):
                    for kh in range(3):
                        for kw in range(3):
                            acc = acc + xp[:, ci, kh:kh + H, kw:kw + Wd] * Wc[co, ci, kh, kw]
                outs.append(jnp.maximum(acc + bc[co], 0.0))
            x = jnp.stack(outs, axis=1)
        N, C, H, Wd = x.shape
        x = x.reshape(N, C, H // 2, 2, Wd // 2, 2).max(axis=(3, 5))   # MaxPool2d(2)
    x = x.reshape(x.shape[0], -1)                          # Flatten (C, H, W order)
    for Wl, bl in params["dense"]:
        x = jnp.maximum(
            jnp.dot(x, Wl, precision=jax.lax.Precision.HIGHEST) + bl, 0.0)
    return x


if __name__ == "__main__":
    key = jax.random.PRNGKey(0)
    kx, kp = jax.random.split(key)
    x = jax.random.normal(kx, (2, 4, 16, 16), jnp.float32)   # NCHW input
    params = build_params(kp)

    out = simple_classifier_forward(x, params)
    out = jax.block_until_ready(out)
    assert out.shape == (2, 2), out.shape
    assert bool(jnp.all(out >= 0.0))                          # trailing ReLU

    ref = jax.block_until_ready(reference_forward(x, params))
    assert jnp.allclose(out, ref, rtol=1e-2, atol=1e-2), (out, ref)

    print("KERNEL_OK")
</pallas_src>

<mosaic_0001>
module attributes {stable_mosaic.version = 11 : i64} {
  func.func @kernel(%arg0: i32, %arg1: memref<2x256xf32, #tpu.memory_space<vmem>>, %arg2: memref<18x256xf32, #tpu.memory_space<vmem>>, %arg3: memref<2xf32, #tpu.memory_space<smem>>, %arg4: memref<36x256xf32, #tpu.memory_space<vmem>>, %arg5: memref<2xf32, #tpu.memory_space<smem>>, %arg6: memref<2x256x12xf32, #tpu.memory_space<vmem>>, %arg7: memref<1x12xf32, #tpu.memory_space<vmem>>, %arg8: memref<12x2xf32, #tpu.memory_space<vmem>>, %arg9: memref<1x2xf32, #tpu.memory_space<vmem>>, %arg10: memref<2x2xf32, #tpu.memory_space<vmem>>) attributes {dimension_semantics = [#tpu.dimension_semantics<parallel>], iteration_bounds = array<i64: 1>, scalar_prefetch = 0 : i64, scratch_operands = 0 : i64, tpu.core_type = #tpu.core_type<tc>, window_params = [{transform_indices = @transform_0, window_bounds = array<i64: 2, 256>}, {pipeline_mode = #tpu.pipeline_mode<synchronous>, transform_indices = @transform_1, window_bounds = array<i64: 18, 256>}, {transform_indices = @transform_2, window_bounds = array<i64: 2>}, {pipeline_mode = #tpu.pipeline_mode<synchronous>, transform_indices = @transform_3, window_bounds = array<i64: 36, 256>}, {transform_indices = @transform_4, window_bounds = array<i64: 2>}, {pipeline_mode = #tpu.pipeline_mode<synchronous>, transform_indices = @transform_5, window_bounds = array<i64: 2, 256, 12>}, {pipeline_mode = #tpu.pipeline_mode<synchronous>, transform_indices = @transform_6, window_bounds = array<i64: 1, 12>}, {pipeline_mode = #tpu.pipeline_mode<synchronous>, transform_indices = @transform_7, window_bounds = array<i64: 12, 2>}, {pipeline_mode = #tpu.pipeline_mode<synchronous>, transform_indices = @transform_8, window_bounds = array<i64: 1, 2>}, {transform_indices = @transform_9, window_bounds = array<i64: 2, 2>}]} {
    %c0 = arith.constant 0 : index
    %c0_0 = arith.constant 0 : index
    %0 = vector.load %arg1[%c0, %c0_0] : memref<2x256xf32, #tpu.memory_space<vmem>>, vector<2x256xf32>
    %c17_i32 = arith.constant 17 : i32
    %1 = tpu.dynamic_rotate %0 by %c17_i32 dim 1 : vector<2x256xf32>, i32 -> vector<2x256xf32>
    %c0_1 = arith.constant 0 : index
    %c0_2 = arith.constant 0 : index
    %2 = vector.load %arg2[%c0_1, %c0_2] : memref<18x256xf32, #tpu.memory_space<vmem>>, vector<1x256xf32>
    %3 = vector.broadcast %2 : vector<1x256xf32> to vector<2x256xf32>
    %4 = arith.mulf %1, %3 : vector<2x256xf32>
    %c16_i32 = arith.constant 16 : i32
    %5 = tpu.dynamic_rotate %0 by %c16_i32 dim 1 : vector<2x256xf32>, i32 -> vector<2x256xf32>
    %c1 = arith.constant 1 : index
    %c0_3 = arith.constant 0 : index
    %6 = vector.load %arg2[%c1, %c0_3] : memref<18x256xf32, #tpu.memory_space<vmem>>, vector<1x256xf32>
    %7 = vector.broadcast %6 : vector<1x256xf32> to vector<2x256xf32>
    %8 = arith.mulf %5, %7 : vector<2x256xf32>
    %9 = arith.addf %4, %8 : vector<2x256xf32>
    %c15_i32 = arith.constant 15 : i32
    %10 = tpu.dynamic_rotate %0 by %c15_i32 dim 1 : vector<2x256xf32>, i32 -> vector<2x256xf32>
    %c2 = arith.constant 2 : index
    %c0_4 = arith.constant 0 : index
    %11 = vector.load %arg2[%c2, %c0_4] : memref<18x256xf32, #tpu.memory_space<vmem>>, vector<1x256xf32>
    %12 = vector.broadcast %11 : vector<1x256xf32> to vector<2x256xf32>
    %13 = arith.mulf %10, %12 : vector<2x256xf32>
    %14 = arith.addf %9, %13 : vector<2x256xf32>
    %c1_i32 = arith.constant 1 : i32
    %15 = tpu.dynamic_rotate %0 by %c1_i32 dim 1 : vector<2x256xf32>, i32 -> vector<2x256xf32>
    %c3 = arith.constant 3 : index
    %c0_5 = arith.constant 0 : index
    %16 = vector.load %arg2[%c3, %c0_5] : memref<18x256xf32, #tpu.memory_space<vmem>>, vector<1x256xf32>
    %17 = vector.broadcast %16 : vector<1x256xf32> to vector<2x256xf32>
    %18 = arith.mulf %15, %17 : vector<2x256xf32>
    %19 = arith.addf %14, %18 : vector<2x256xf32>
    %c4 = arith.constant 4 : index
    %c0_6 = arith.constant 0 : index
    %20 = vector.load %arg2[%c4, %c0_6] : memref<18x256xf32, #tpu.memory_space<vmem>>, vector<1x256xf32>
    %21 = vector.broadcast %20 : vector<1x256xf32> to vector<2x256xf32>
    %22 = arith.mulf %0, %21 : vector<2x256xf32>
    %23 = arith.addf %19, %22 : vector<2x256xf32>
    %c255_i32 = arith.constant 255 : i32
    %24 = tpu.dynamic_rotate %0 by %c255_i32 dim 1 : vector<2x256xf32>, i32 -> vector<2x256xf32>
    %c5 = arith.constant 5 : index
    %c0_7 = arith.constant 0 : index
    %25 = vector.load %arg2[%c5, %c0_7] : memref<18x256xf32, #tpu.memory_space<vmem>>, vector<1x256xf32>
    %26 = vector.broadcast %25 : vector<1x256xf32> to vector<2x256xf32>
    %27 = arith.mulf %24, %26 : vector<2x256xf32>
    %28 = arith.addf %23, %27 : vector<2x256xf32>
    %c241_i32 = arith.constant 241 : i32
    %29 = tpu.dynamic_rotate %0 by %c241_i32 dim 1 : vector<2x256xf32>, i32 -> vector<2x256xf32>
    %c6 = arith.constant 6 : index
    %c0_8 = arith.constant 0 : index
    %30 = vector.load %arg2[%c6, %c0_8] : memref<18x256xf32, #tpu.memory_space<vmem>>, vector<1x256xf32>
    %31 = vector.broadcast %30 : vector<1x256xf32> to vector<2x256xf32>
    %32 = arith.mulf %29, %31 : vector<2x256xf32>
    %33 = arith.addf %28, %32 : vector<2x256xf32>
    %c240_i32 = arith.constant 240 : i32
    %34 = tpu.dynamic_rotate %0 by %c240_i32 dim 1 : vector<2x256xf32>, i32 -> vector<2x256xf32>
    %c7 = arith.constant 7 : index
    %c0_9 = arith.constant 0 : index
    %35 = vector.load %arg2[%c7, %c0_9] : memref<18x256xf32, #tpu.memory_space<vmem>>, vector<1x256xf32>
    %36 = vector.broadcast %35 : vector<1x256xf32> to vector<2x256xf32>
    %37 = arith.mulf %34, %36 : vector<2x256xf32>
    %38 = arith.addf %33, %37 : vector<2x256xf32>
    %c239_i32 = arith.constant 239 : i32
    %39 = tpu.dynamic_rotate %0 by %c239_i32 dim 1 : vector<2x256xf32>, i32 -> vector<2x256xf32>
    %c8 = arith.constant 8 : index
    %c0_10 = arith.constant 0 : index
    %40 = vector.load %arg2[%c8, %c0_10] : memref<18x256xf32, #tpu.memory_space<vmem>>, vector<1x256xf32>
    %41 = vector.broadcast %40 : vector<1x256xf32> to vector<2x256xf32>
    %42 = arith.mulf %39, %41 : vector<2x256xf32>
    %43 = arith.addf %38, %42 : vector<2x256xf32>
    %c0_11 = arith.constant 0 : index
    %44 = memref.load %arg3[%c0_11] : memref<2xf32, #tpu.memory_space<smem>>
    %45 = vector.broadcast %44 : f32 to vector<2x256xf32>
    %46 = arith.addf %43, %45 : vector<2x256xf32>
    %cst = arith.constant 0.000000e+00 : f32
    %47 = vector.broadcast %cst : f32 to vector<2x256xf32>
    %48 = arith.maximumf %46, %47 : vector<2x256xf32>
    %c17_i32_12 = arith.constant 17 : i32
    %49 = tpu.dynamic_rotate %0 by %c17_i32_12 dim 1 : vector<2x256xf32>, i32 -> vector<2x256xf32>
    %c9 = arith.constant 9 : index
    %c0_13 = arith.constant 0 : index
    %50 = vector.load %arg2[%c9, %c0_13] : memref<18x256xf32, #tpu.memory_space<vmem>>, vector<1x256xf32>
    %51 = vector.broadcast %50 : vector<1x256xf32> to vector<2x256xf32>
    %52 = arith.mulf %49, %51 : vector<2x256xf32>
    %c16_i32_14 = arith.constant 16 : i32
    %53 = tpu.dynamic_rotate %0 by %c16_i32_14 dim 1 : vector<2x256xf32>, i32 -> vector<2x256xf32>
    %c10 = arith.constant 10 : index
    %c0_15 = arith.constant 0 : index
    %54 = vector.load %arg2[%c10, %c0_15] : memref<18x256xf32, #tpu.memory_space<vmem>>, vector<1x256xf32>
    %55 = vector.broadcast %54 : vector<1x256xf32> to vector<2x256xf32>
    %56 = arith.mulf %53, %55 : vector<2x256xf32>
    %57 = arith.addf %52, %56 : vector<2x256xf32>
    %c15_i32_16 = arith.constant 15 : i32
    %58 = tpu.dynamic_rotate %0 by %c15_i32_16 dim 1 : vector<2x256xf32>, i32 -> vector<2x256xf32>
    %c11 = arith.constant 11 : index
    %c0_17 = arith.constant 0 : index
    %59 = vector.load %arg2[%c11, %c0_17] : memref<18x256xf32, #tpu.memory_space<vmem>>, vector<1x256xf32>
    %60 = vector.broadcast %59 : vector<1x256xf32> to vector<2x256xf32>
    %61 = arith.mulf %58, %60 : vector<2x256xf32>
    %62 = arith.addf %57, %61 : vector<2x256xf32>
    %c1_i32_18 = arith.constant 1 : i32
    %63 = tpu.dynamic_rotate %0 by %c1_i32_18 dim 1 : vector<2x256xf32>, i32 -> vector<2x256xf32>
    %c12 = arith.constant 12 : index
    %c0_19 = arith.constant 0 : index
    %64 = vector.load %arg2[%c12, %c0_19] : memref<18x256xf32, #tpu.memory_space<vmem>>, vector<1x256xf32>
    %65 = vector.broadcast %64 : vector<1x256xf32> to vector<2x256xf32>
    %66 = arith.mulf %63, %65 : vector<2x256xf32>
    %67 = arith.addf %62, %66 : vector<2x256xf32>
    %c13 = arith.constant 13 : index
    %c0_20 = arith.constant 0 : index
    %68 = vector.load %arg2[%c13, %c0_20] : memref<18x256xf32, #tpu.memory_space<vmem>>, vector<1x256xf32>
    %69 = vector.broadcast %68 : vector<1x256xf32> to vector<2x256xf32>
    %70 = arith.mulf %0, %69 : vector<2x256xf32>
    %71 = arith.addf %67, %70 : vector<2x256xf32>
    %c255_i32_21 = arith.constant 255 : i32
    %72 = tpu.dynamic_rotate %0 by %c255_i32_21 dim 1 : vector<2x256xf32>, i32 -> vector<2x256xf32>
    %c14 = arith.constant 14 : index
    %c0_22 = arith.constant 0 : index
    %73 = vector.load %arg2[%c14, %c0_22] : memref<18x256xf32, #tpu.memory_space<vmem>>, vector<1x256xf32>
    %74 = vector.broadcast %73 : vector<1x256xf32> to vector<2x256xf32>
    %75 = arith.mulf %72, %74 : vector<2x256xf32>
    %76 = arith.addf %71, %75 : vector<2x256xf32>
    %c241_i32_23 = arith.constant 241 : i32
    %77 = tpu.dynamic_rotate %0 by %c241_i32_23 dim 1 : vector<2x256xf32>, i32 -> vector<2x256xf32>
    %c15 = arith.constant 15 : index
    %c0_24 = arith.constant 0 : index
    %78 = vector.load %arg2[%c15, %c0_24] : memref<18x256xf32, #tpu.memory_space<vmem>>, vector<1x256xf32>
    %79 = vector.broadcast %78 : vector<1x256xf32> to vector<2x256xf32>
    %80 = arith.mulf %77, %79 : vector<2x256xf32>
    %81 = arith.addf %76, %80 : vector<2x256xf32>
    %c240_i32_25 = arith.constant 240 : i32
    %82 = tpu.dynamic_rotate %0 by %c240_i32_25 dim 1 : vector<2x256xf32>, i32 -> vector<2x256xf32>
    %c16 = arith.constant 16 : index
    %c0_26 = arith.constant 0 : index
    %83 = vector.load %arg2[%c16, %c0_26] : memref<18x256xf32, #tpu.memory_space<vmem>>, vector<1x256xf32>
    %84 = vector.broadcast %83 : vector<1x256xf32> to vector<2x256xf32>
    %85 = arith.mulf %82, %84 : vector<2x256xf32>
    %86 = arith.addf %81, %85 : vector<2x256xf32>
    %c239_i32_27 = arith.constant 239 : i32
    %87 = tpu.dynamic_rotate %0 by %c239_i32_27 dim 1 : vector<2x256xf32>, i32 -> vector<2x256xf32>
    %c17 = arith.constant 17 : index
    %c0_28 = arith.constant 0 : index
    %88 = vector.load %arg2[%c17, %c0_28] : memref<18x256xf32, #tpu.memory_space<vmem>>, vector<1x256xf32>
    %89 = vector.broadcast %88 : vector<1x256xf32> to vector<2x256xf32>
    %90 = arith.mulf %87, %89 : vector<2x256xf32>
    %91 = arith.addf %86, %90 : vector<2x256xf32>
    %c1_29 = arith.constant 1 : index
    %92 = memref.load %arg3[%c1_29] : memref<2xf32, #tpu.memory_space<smem>>
    %93 = vector.broadcast %92 : f32 to vector<2x256xf32>
    %94 = arith.addf %91, %93 : vector<2x256xf32>
    %cst_30 = arith.constant 0.000000e+00 : f32
    %95 = vector.broadcast %cst_30 : f32 to vector<2x256xf32>
    %96 = arith.maximumf %94, %95 : vector<2x256xf32>
    %c17_i32_31 = arith.constant 17 : i32
    %97 = tpu.dynamic_rotate %48 by %c17_i32_31 dim 1 : vector<2x256xf32>, i32 -> vector<2x256xf32>
    %c0_32 = arith.constant 0 : index
    %c0_33 = arith.constant 0 : index
    %98 = vector.load %arg4[%c0_32, %c0_33] : memref<36x256xf32, #tpu.memory_space<vmem>>, vector<1x256xf32>
    %99 = vector.broadcast %98 : vector<1x256xf32> to vector<2x256xf32>
    %100 = arith.mulf %97, %99 : vector<2x256xf32>
    %c16_i32_34 = arith.constant 16 : i32
    %101 = tpu.dynamic_rotate %48 by %c16_i32_34 dim 1 : vector<2x256xf32>, i32 -> vector<2x256xf32>
    %c1_35 = arith.constant 1 : index
    %c0_36 = arith.constant 0 : index
    %102 = vector.load %arg4[%c1_35, %c0_36] : memref<36x256xf32, #tpu.memory_space<vmem>>, vector<1x256xf32>
    %103 = vector.broadcast %102 : vector<1x256xf32> to vector<2x256xf32>
    %104 = arith.mulf %101, %103 : vector<2x256xf32>
    %105 = arith.addf %100, %104 : vector<2x256xf32>
    %c15_i32_37 = arith.constant 15 : i32
    %106 = tpu.dynamic_rotate %48 by %c15_i32_37 dim 1 : vector<2x256xf32>, i32 -> vector<2x256xf32>
    %c2_38 = arith.constant 2 : index
    %c0_39 = arith.constant 0 : index
    %107 = vector.load %arg4[%c2_38, %c0_39] : memref<36x256xf32, #tpu.memory_space<vmem>>, vector<1x256xf32>
    %108 = vector.broadcast %107 : vector<1x256xf32> to vector<2x256xf32>
    %109 = arith.mulf %106, %108 : vector<2x256xf32>
    %110 = arith.addf %105, %109 : vector<2x256xf32>
    %c1_i32_40 = arith.constant 1 : i32
    %111 = tpu.dynamic_rotate %48 by %c1_i32_40 dim 1 : vector<2x256xf32>, i32 -> vector<2x256xf32>
    %c3_41 = arith.constant 3 : index
    %c0_42 = arith.constant 0 : index
    %112 = vector.load %arg4[%c3_41, %c0_42] : memref<36x256xf32, #tpu.memory_space<vmem>>, vector<1x256xf32>
    %113 = vector.broadcast %112 : vector<1x256xf32> to vector<2x256xf32>
    %114 = arith.mulf %111, %113 : vector<2x256xf32>
    %115 = arith.addf %110, %114 : vector<2x256xf32>
    %c4_43 = arith.constant 4 : index
    %c0_44 = arith.constant 0 : index
    %116 = vector.load %arg4[%c4_43, %c0_44] : memref<36x256xf32, #tpu.memory_space<vmem>>, vector<1x256xf32>
    %117 = vector.broadcast %116 : vector<1x256xf32> to vector<2x256xf32>
    %118 = arith.mulf %48, %117 : vector<2x256xf32>
    %119 = arith.addf %115, %118 : vector<2x256xf32>
    %c255_i32_45 = arith.constant 255 : i32
    %120 = tpu.dynamic_rotate %48 by %c255_i32_45 dim 1 : vector<2x256xf32>, i32 -> vector<2x256xf32>
    %c5_46 = arith.constant 5 : index
    %c0_47 = arith.constant 0 : index
    %121 = vector.load %arg4[%c5_46, %c0_47] : memref<36x256xf32, #tpu.memory_space<vmem>>, vector<1x256xf32>
    %122 = vector.broadcast %121 : vector<1x256xf32> to vector<2x256xf32>
    %123 = arith.mulf %120, %122 : vector<2x256xf32>
    %124 = arith.addf %119, %123 : vector<2x256xf32>
    %c241_i32_48 = arith.constant 241 : i32
    %125 = tpu.dynamic_rotate %48 by %c241_i32_48 dim 1 : vector<2x256xf32>, i32 -> vector<2x256xf32>
    %c6_49 = arith.constant 6 : index
    %c0_50 = arith.constant 0 : index
    %126 = vector.load %arg4[%c6_49, %c0_50] : memref<36x256xf32, #tpu.memory_space<vmem>>, vector<1x256xf32>
    %127 = vector.broadcast %126 : vector<1x256xf32> to vector<2x256xf32>
    %128 = arith.mulf %125, %127 : vector<2x256xf32>
    %129 = arith.addf %124, %128 : vector<2x256xf32>
    %c240_i32_51 = arith.constant 240 : i32
    %130 = tpu.dynamic_rotate %48 by %c240_i32_51 dim 1 : vector<2x256xf32>, i32 -> vector<2x256xf32>
    %c7_52 = arith.constant 7 : index
    %c0_53 = arith.constant 0 : index
    %131 = vector.load %arg4[%c7_52, %c0_53] : memref<36x256xf32, #tpu.memory_space<vmem>>, vector<1x256xf32>
    %132 = vector.broadcast %131 : vector<1x256xf32> to vector<2x256xf32>
    %133 = arith.mulf %130, %132 : vector<2x256xf32>
    %134 = arith.addf %129, %133 : vector<2x256xf32>
    %c239_i32_54 = arith.constant 239 : i32
    %135 = tpu.dynamic_rotate %48 by %c239_i32_54 dim 1 : vector<2x256xf32>, i32 -> vector<2x256xf32>
    %c8_55 = arith.constant 8 : index
    %c0_56 = arith.constant 0 : index
    %136 = vector.load %arg4[%c8_55, %c0_56] : memref<36x256xf32, #tpu.memory_space<vmem>>, vector<1x256xf32>
    %137 = vector.broadcast %136 : vector<1x256xf32> to vector<2x256xf32>
    %138 = arith.mulf %135, %137 : vector<2x256xf32>
    %139 = arith.addf %134, %138 : vector<2x256xf32>
    %c17_i32_57 = arith.constant 17 : i32
    %140 = tpu.dynamic_rotate %96 by %c17_i32_57 dim 1 : vector<2x256xf32>, i32 -> vector<2x256xf32>
    %c9_58 = arith.constant 9 : index
    %c0_59 = arith.constant 0 : index
    %141 = vector.load %arg4[%c9_58, %c0_59] : memref<36x256xf32, #tpu.memory_space<vmem>>, vector<1x256xf32>
    %142 = vector.broadcast %141 : vector<1x256xf32> to vector<2x256xf32>
    %143 = arith.mulf %140, %142 : vector<2x256xf32>
    %144 = arith.addf %139, %143 : vector<2x256xf32>
    %c16_i32_60 = arith.constant 16 : i32
    %145 = tpu.dynamic_rotate %96 by %c16_i32_60 dim 1 : vector<2x256xf32>, i32 -> vector<2x256xf32>
    %c10_61 = arith.constant 10 : index
    %c0_62 = arith.constant 0 : index
    %146 = vector.load %arg4[%c10_61, %c0_62] : memref<36x256xf32, #tpu.memory_space<vmem>>, vector<1x256xf32>
    %147 = vector.broadcast %146 : vector<1x256xf32> to vector<2x256xf32>
    %148 = arith.mulf %145, %147 : vector<2x256xf32>
    %149 = arith.addf %144, %148 : vector<2x256xf32>
    %c15_i32_63 = arith.constant 15 : i32
    %150 = tpu.dynamic_rotate %96 by %c15_i32_63 dim 1 : vector<2x256xf32>, i32 -> vector<2x256xf32>
    %c11_64 = arith.constant 11 : index
    %c0_65 = arith.constant 0 : index
    %151 = vector.load %arg4[%c11_64, %c0_65] : memref<36x256xf32, #tpu.memory_space<vmem>>, vector<1x256xf32>
    %152 = vector.broadcast %151 : vector<1x256xf32> to vector<2x256xf32>
    %153 = arith.mulf %150, %152 : vector<2x256xf32>
    %154 = arith.addf %149, %153 : vector<2x256xf32>
    %c1_i32_66 = arith.constant 1 : i32
    %155 = tpu.dynamic_rotate %96 by %c1_i32_66 dim 1 : vector<2x256xf32>, i32 -> vector<2x256xf32>
    %c12_67 = arith.constant 12 : index
    %c0_68 = arith.constant 0 : index
    %156 = vector.load %arg4[%c12_67, %c0_68] : memref<36x256xf32, #tpu.memory_space<vmem>>, vector<1x256xf32>
    %157 = vector.broadcast %156 : vector<1x256xf32> to vector<2x256xf32>
    %158 = arith.mulf %155, %157 : vector<2x256xf32>
    %159 = arith.addf %154, %158 : vector<2x256xf32>
    %c13_69 = arith.constant 13 : index
    %c0_70 = arith.constant 0 : index
    %160 = vector.load %arg4[%c13_69, %c0_70] : memref<36x256xf32, #tpu.memory_space<vmem>>, vector<1x256xf32>
    %161 = vector.broadcast %160 : vector<1x256xf32> to vector<2x256xf32>
    %162 = arith.mulf %96, %161 : vector<2x256xf32>
    %163 = arith.addf %159, %162 : vector<2x256xf32>
    %c255_i32_71 = arith.constant 255 : i32
    %164 = tpu.dynamic_rotate %96 by %c255_i32_71 dim 1 : vector<2x256xf32>, i32 -> vector<2x256xf32>
    %c14_72 = arith.constant 14 : index
    %c0_73 = arith.constant 0 : index
    %165 = vector.load %arg4[%c14_72, %c0_73] : memref<36x256xf32, #tpu.memory_space<vmem>>, vector<1x256xf32>
    %166 = vector.broadcast %165 : vector<1x256xf32> to vector<2x256xf32>
    %167 = arith.mulf %164, %166 : vector<2x256xf32>
    %168 = arith.addf %163, %167 : vector<2x256xf32>
    %c241_i32_74 = arith.constant 241 : i32
    %169 = tpu.dynamic_rotate %96 by %c241_i32_74 dim 1 : vector<2x256xf32>, i32 -> vector<2x256xf32>
    %c15_75 = arith.constant 15 : index
    %c0_76 = arith.constant 0 : index
    %170 = vector.load %arg4[%c15_75, %c0_76] : memref<36x256xf32, #tpu.memory_space<vmem>>, vector<1x256xf32>
    %171 = vector.broadcast %170 : vector<1x256xf32> to vector<2x256xf32>
    %172 = arith.mulf %169, %171 : vector<2x256xf32>
    %173 = arith.addf %168, %172 : vector<2x256xf32>
    %c240_i32_77 = arith.constant 240 : i32
    %174 = tpu.dynamic_rotate %96 by %c240_i32_77 dim 1 : vector<2x256xf32>, i32 -> vector<2x256xf32>
    %c16_78 = arith.constant 16 : index
    %c0_79 = arith.constant 0 : index
    %175 = vector.load %arg4[%c16_78, %c0_79] : memref<36x256xf32, #tpu.memory_space<vmem>>, vector<1x256xf32>
    %176 = vector.broadcast %175 : vector<1x256xf32> to vector<2x256xf32>
    %177 = arith.mulf %174, %176 : vector<2x256xf32>
    %178 = arith.addf %173, %177 : vector<2x256xf32>
    %c239_i32_80 = arith.constant 239 : i32
    %179 = tpu.dynamic_rotate %96 by %c239_i32_80 dim 1 : vector<2x256xf32>, i32 -> vector<2x256xf32>
    %c17_81 = arith.constant 17 : index
    %c0_82 = arith.constant 0 : index
    %180 = vector.load %arg4[%c17_81, %c0_82] : memref<36x256xf32, #tpu.memory_space<vmem>>, vector<1x256xf32>
    %181 = vector.broadcast %180 : vector<1x256xf32> to vector<2x256xf32>
    %182 = arith.mulf %179, %181 : vector<2x256xf32>
    %183 = arith.addf %178, %182 : vector<2x256xf32>
    %c0_83 = arith.constant 0 : index
    %184 = memref.load %arg5[%c0_83] : memref<2xf32, #tpu.memory_space<smem>>
    %185 = vector.broadcast %184 : f32 to vector<2x256xf32>
    %186 = arith.addf %183, %185 : vector<2x256xf32>
    %cst_84 = arith.constant 0.000000e+00 : f32
    %187 = vector.broadcast %cst_84 : f32 to vector<2x256xf32>
    %188 = arith.maximumf %186, %187 : vector<2x256xf32>
    %c240_i32_85 = arith.constant 240 : i32
    %189 = tpu.dynamic_rotate %188 by %c240_i32_85 dim 1 : vector<2x256xf32>, i32 -> vector<2x256xf32>
    %190 = arith.maximumf %188, %189 : vector<2x256xf32>
    %c255_i32_86 = arith.constant 255 : i32
    %191 = tpu.dynamic_rotate %190 by %c255_i32_86 dim 1 : vector<2x256xf32>, i32 -> vector<2x256xf32>
    %192 = arith.maximumf %190, %191 : vector<2x256xf32>
    %c0_87 = arith.constant 0 : index
    %c0_88 = arith.constant 0 : index
    %c0_89 = arith.constant 0 : index
    %193 = vector.load %arg6[%c0_87, %c0_88, %c0_89] : memref<2x256x12xf32, #tpu.memory_space<vmem>>, vector<1x256x12xf32>
    %194 = vector.shape_cast %193 : vector<1x256x12xf32> to vector<256x12xf32>
    %cst_90 = arith.constant dense<0.000000e+00> : vector<2x12xf32>
    %195 = tpu.matmul %192, %194, %cst_90 {dimension_numbers = #tpu.dot_dimension_numbers<[1], [0], [0], [1], [0, 0, 1, 1], [], []>} : vector<2x256xf32>, vector<256x12xf32>, vector<2x12xf32> -> vector<2x12xf32>
    %c17_i32_91 = arith.constant 17 : i32
    %196 = tpu.dynamic_rotate %48 by %c17_i32_91 dim 1 : vector<2x256xf32>, i32 -> vector<2x256xf32>
    %c18 = arith.constant 18 : index
    %c0_92 = arith.constant 0 : index
    %197 = vector.load %arg4[%c18, %c0_92] : memref<36x256xf32, #tpu.memory_space<vmem>>, vector<1x256xf32>
    %198 = vector.broadcast %197 : vector<1x256xf32> to vector<2x256xf32>
    %199 = arith.mulf %196, %198 : vector<2x256xf32>
    %c16_i32_93 = arith.constant 16 : i32
    %200 = tpu.dynamic_rotate %48 by %c16_i32_93 dim 1 : vector<2x256xf32>, i32 -> vector<2x256xf32>
    %c19 = arith.constant 19 : index
    %c0_94 = arith.constant 0 : index
    %201 = vector.load %arg4[%c19, %c0_94] : memref<36x256xf32, #tpu.memory_space<vmem>>, vector<1x256xf32>
    %202 = vector.broadcast %201 : vector<1x256xf32> to vector<2x256xf32>
    %203 = arith.mulf %200, %202 : vector<2x256xf32>
    %204 = arith.addf %199, %203 : vector<2x256xf32>
    %c15_i32_95 = arith.constant 15 : i32
    %205 = tpu.dynamic_rotate %48 by %c15_i32_95 dim 1 : vector<2x256xf32>, i32 -> vector<2x256xf32>
    %c20 = arith.constant 20 : index
    %c0_96 = arith.constant 0 : index
    %206 = vector.load %arg4[%c20, %c0_96] : memref<36x256xf32, #tpu.memory_space<vmem>>, vector<1x256xf32>
    %207 = vector.broadcast %206 : vector<1x256xf32> to vector<2x256xf32>
    %208 = arith.mulf %205, %207 : vector<2x256xf32>
    %209 = arith.addf %204, %208 : vector<2x256xf32>
    %c1_i32_97 = arith.constant 1 : i32
    %210 = tpu.dynamic_rotate %48 by %c1_i32_97 dim 1 : vector<2x256xf32>, i32 -> vector<2x256xf32>
    %c21 = arith.constant 21 : index
    %c0_98 = arith.constant 0 : index
    %211 = vector.load %arg4[%c21, %c0_98] : memref<36x256xf32, #tpu.memory_space<vmem>>, vector<1x256xf32>
    %212 = vector.broadcast %211 : vector<1x256xf32> to vector<2x256xf32>
    %213 = arith.mulf %210, %212 : vector<2x256xf32>
    %214 = arith.addf %209, %213 : vector<2x256xf32>
    %c22 = arith.constant 22 : index
    %c0_99 = arith.constant 0 : index
    %215 = vector.load %arg4[%c22, %c0_99] : memref<36x256xf32, #tpu.memory_space<vmem>>, vector<1x256xf32>
    %216 = vector.broadcast %215 : vector<1x256xf32> to vector<2x256xf32>
    %217 = arith.mulf %48, %216 : vector<2x256xf32>
    %218 = arith.addf %214, %217 : vector<2x256xf32>
    %c255_i32_100 = arith.constant 255 : i32
    %219 = tpu.dynamic_rotate %48 by %c255_i32_100 dim 1 : vector<2x256xf32>, i32 -> vector<2x256xf32>
    %c23 = arith.constant 23 : index
    %c0_101 = arith.constant 0 : index
    %220 = vector.load %arg4[%c23, %c0_101] : memref<36x256xf32, #tpu.memory_space<vmem>>, vector<1x256xf32>
    %221 = vector.broadcast %220 : vector<1x256xf32> to vector<2x256xf32>
    %222 = arith.mulf %219, %221 : vector<2x256xf32>
    %223 = arith.addf %218, %222 : vector<2x256xf32>
    %c241_i32_102 = arith.constant 241 : i32
    %224 = tpu.dynamic_rotate %48 by %c241_i32_102 dim 1 : vector<2x256xf32>, i32 -> vector<2x256xf32>
    %c24 = arith.constant 24 : index
    %c0_103 = arith.constant 0 : index
    %225 = vector.load %arg4[%c24, %c0_103] : memref<36x256xf32, #tpu.memory_space<vmem>>, vector<1x256xf32>
    %226 = vector.broadcast %225 : vector<1x256xf32> to vector<2x256xf32>
    %227 = arith.mulf %224, %226 : vector<2x256xf32>
    %228 = arith.addf %223, %227 : vector<2x256xf32>
    %c240_i32_104 = arith.constant 240 : i32
    %229 = tpu.dynamic_rotate %48 by %c240_i32_104 dim 1 : vector<2x256xf32>, i32 -> vector<2x256xf32>
    %c25 = arith.constant 25 : index
    %c0_105 = arith.constant 0 : index
    %230 = vector.load %arg4[%c25, %c0_105] : memref<36x256xf32, #tpu.memory_space<vmem>>, vector<1x256xf32>
    %231 = vector.broadcast %230 : vector<1x256xf32> to vector<2x256xf32>
    %232 = arith.mulf %229, %231 : vector<2x256xf32>
    %233 = arith.addf %228, %232 : vector<2x256xf32>
    %c239_i32_106 = arith.constant 239 : i32
    %234 = tpu.dynamic_rotate %48 by %c239_i32_106 dim 1 : vector<2x256xf32>, i32 -> vector<2x256xf32>
    %c26 = arith.constant 26 : index
    %c0_107 = arith.constant 0 : index
    %235 = vector.load %arg4[%c26, %c0_107] : memref<36x256xf32, #tpu.memory_space<vmem>>, vector<1x256xf32>
    %236 = vector.broadcast %235 : vector<1x256xf32> to vector<2x256xf32>
    %237 = arith.mulf %234, %236 : vector<2x256xf32>
    %238 = arith.addf %233, %237 : vector<2x256xf32>
    %c17_i32_108 = arith.constant 17 : i32
    %239 = tpu.dynamic_rotate %96 by %c17_i32_108 dim 1 : vector<2x256xf32>, i32 -> vector<2x256xf32>
    %c27 = arith.constant 27 : index
    %c0_109 = arith.constant 0 : index
    %240 = vector.load %arg4[%c27, %c0_109] : memref<36x256xf32, #tpu.memory_space<vmem>>, vector<1x256xf32>
    %241 = vector.broadcast %240 : vector<1x256xf32> to vector<2x256xf32>
    %242 = arith.mulf %239, %241 : vector<2x256xf32>
    %243 = arith.addf %238, %242 : vector<2x256xf32>
    %c16_i32_110 = arith.constant 16 : i32
    %244 = tpu.dynamic_rotate %96 by %c16_i32_110 dim 1 : vector<2x256xf32>, i32 -> vector<2x256xf32>
    %c28 = arith.constant 28 : index
    %c0_111 = arith.constant 0 : index
    %245 = vector.load %arg4[%c28, %c0_111] : memref<36x256xf32, #tpu.memory_space<vmem>>, vector<1x256xf32>
    %246 = vector.broadcast %245 : vector<1x256xf32> to vector<2x256xf32>
    %247 = arith.mulf %244, %246 : vector<2x256xf32>
    %248 = arith.addf %243, %247 : vector<2x256xf32>
    %c15_i32_112 = arith.constant 15 : i32
    %249 = tpu.dynamic_rotate %96 by %c15_i32_112 dim 1 : vector<2x256xf32>, i32 -> vector<2x256xf32>
    %c29 = arith.constant 29 : index
    %c0_113 = arith.constant 0 : index
    %250 = vector.load %arg4[%c29, %c0_113] : memref<36x256xf32, #tpu.memory_space<vmem>>, vector<1x256xf32>
    %251 = vector.broadcast %250 : vector<1x256xf32> to vector<2x256xf32>
    %252 = arith.mulf %249, %251 : vector<2x256xf32>
    %253 = arith.addf %248, %252 : vector<2x256xf32>
    %c1_i32_114 = arith.constant 1 : i32
    %254 = tpu.dynamic_rotate %96 by %c1_i32_114 dim 1 : vector<2x256xf32>, i32 -> vector<2x256xf32>
    %c30 = arith.constant 30 : index
    %c0_115 = arith.constant 0 : index
    %255 = vector.load %arg4[%c30, %c0_115] : memref<36x256xf32, #tpu.memory_space<vmem>>, vector<1x256xf32>
    %256 = vector.broadcast %255 : vector<1x256xf32> to vector<2x256xf32>
    %257 = arith.mulf %254, %256 : vector<2x256xf32>
    %258 = arith.addf %253, %257 : vector<2x256xf32>
    %c31 = arith.constant 31 : index
    %c0_116 = arith.constant 0 : index
    %259 = vector.load %arg4[%c31, %c0_116] : memref<36x256xf32, #tpu.memory_space<vmem>>, vector<1x256xf32>
    %260 = vector.broadcast %259 : vector<1x256xf32> to vector<2x256xf32>
    %261 = arith.mulf %96, %260 : vector<2x256xf32>
    %262 = arith.addf %258, %261 : vector<2x256xf32>
    %c255_i32_117 = arith.constant 255 : i32
    %263 = tpu.dynamic_rotate %96 by %c255_i32_117 dim 1 : vector<2x256xf32>, i32 -> vector<2x256xf32>
    %c32 = arith.constant 32 : index
    %c0_118 = arith.constant 0 : index
    %264 = vector.load %arg4[%c32, %c0_118] : memref<36x256xf32, #tpu.memory_space<vmem>>, vector<1x256xf32>
    %265 = vector.broadcast %264 : vector<1x256xf32> to vector<2x256xf32>
    %266 = arith.mulf %263, %265 : vector<2x256xf32>
    %267 = arith.addf %262, %266 : vector<2x256xf32>
    %c241_i32_119 = arith.constant 241 : i32
    %268 = tpu.dynamic_rotate %96 by %c241_i32_119 dim 1 : vector<2x256xf32>, i32 -> vector<2x256xf32>
    %c33 = arith.constant 33 : index
    %c0_120 = arith.constant 0 : index
    %269 = vector.load %arg4[%c33, %c0_120] : memref<36x256xf32, #tpu.memory_space<vmem>>, vector<1x256xf32>
    %270 = vector.broadcast %269 : vector<1x256xf32> to vector<2x256xf32>
    %271 = arith.mulf %268, %270 : vector<2x256xf32>
    %272 = arith.addf %267, %271 : vector<2x256xf32>
    %c240_i32_121 = arith.constant 240 : i32
    %273 = tpu.dynamic_rotate %96 by %c240_i32_121 dim 1 : vector<2x256xf32>, i32 -> vector<2x256xf32>
    %c34 = arith.constant 34 : index
    %c0_122 = arith.constant 0 : index
    %274 = vector.load %arg4[%c34, %c0_122] : memref<36x256xf32, #tpu.memory_space<vmem>>, vector<1x256xf32>
    %275 = vector.broadcast %274 : vector<1x256xf32> to vector<2x256xf32>
    %276 = arith.mulf %273, %275 : vector<2x256xf32>
    %277 = arith.addf %272, %276 : vector<2x256xf32>
    %c239_i32_123 = arith.constant 239 : i32
    %278 = tpu.dynamic_rotate %96 by %c239_i32_123 dim 1 : vector<2x256xf32>, i32 -> vector<2x256xf32>
    %c35 = arith.constant 35 : index
    %c0_124 = arith.constant 0 : index
    %279 = vector.load %arg4[%c35, %c0_124] : memref<36x256xf32, #tpu.memory_space<vmem>>, vector<1x256xf32>
    %280 = vector.broadcast %279 : vector<1x256xf32> to vector<2x256xf32>
    %281 = arith.mulf %278, %280 : vector<2x256xf32>
    %282 = arith.addf %277, %281 : vector<2x256xf32>
    %c1_125 = arith.constant 1 : index
    %283 = memref.load %arg5[%c1_125] : memref<2xf32, #tpu.memory_space<smem>>
    %284 = vector.broadcast %283 : f32 to vector<2x256xf32>
    %285 = arith.addf %282, %284 : vector<2x256xf32>
    %cst_126 = arith.constant 0.000000e+00 : f32
    %286 = vector.broadcast %cst_126 : f32 to vector<2x256xf32>
    %287 = arith.maximumf %285, %286 : vector<2x256xf32>
    %c240_i32_127 = arith.constant 240 : i32
    %288 = tpu.dynamic_rotate %287 by %c240_i32_127 dim 1 : vector<2x256xf32>, i32 -> vector<2x256xf32>
    %289 = arith.maximumf %287, %288 : vector<2x256xf32>
    %c255_i32_128 = arith.constant 255 : i32
    %290 = tpu.dynamic_rotate %289 by %c255_i32_128 dim 1 : vector<2x256xf32>, i32 -> vector<2x256xf32>
    %291 = arith.maximumf %289, %290 : vector<2x256xf32>
    %c1_129 = arith.constant 1 : index
    %c0_130 = arith.constant 0 : index
    %c0_131 = arith.constant 0 : index
    %292 = vector.load %arg6[%c1_129, %c0_130, %c0_131] : memref<2x256x12xf32, #tpu.memory_space<vmem>>, vector<1x256x12xf32>
    %293 = vector.shape_cast %292 : vector<1x256x12xf32> to vector<256x12xf32>
    %cst_132 = arith.constant dense<0.000000e+00> : vector<2x12xf32>
    %294 = tpu.matmul %291, %293, %cst_132 {dimension_numbers = #tpu.dot_dimension_numbers<[1], [0], [0], [1], [0, 0, 1, 1], [], []>} : vector<2x256xf32>, vector<256x12xf32>, vector<2x12xf32> -> vector<2x12xf32>
    %295 = arith.addf %195, %294 : vector<2x12xf32>
    %c0_133 = arith.constant 0 : index
    %c0_134 = arith.constant 0 : index
    %296 = vector.load %arg7[%c0_133, %c0_134] : memref<1x12xf32, #tpu.memory_space<vmem>>, vector<1x12xf32>
    %297 = vector.broadcast %296 : vector<1x12xf32> to vector<2x12xf32>
    %298 = arith.addf %295, %297 : vector<2x12xf32>
    %cst_135 = arith.constant 0.000000e+00 : f32
    %299 = vector.broadcast %cst_135 : f32 to vector<2x12xf32>
    %300 = arith.maximumf %298, %299 : vector<2x12xf32>
    %c0_136 = arith.constant 0 : index
    %c0_137 = arith.constant 0 : index
    %301 = vector.load %arg8[%c0_136, %c0_137] : memref<12x2xf32, #tpu.memory_space<vmem>>, vector<12x2xf32>
    %c0_138 = arith.constant 0 : index
    %c0_139 = arith.constant 0 : index
    %302 = vector.load %arg9[%c0_138, %c0_139] : memref<1x2xf32, #tpu.memory_space<vmem>>, vector<1x2xf32>
    %cst_140 = arith.constant dense<0.000000e+00> : vector<2x2xf32>
    %303 = tpu.matmul %300, %301, %cst_140 {dimension_numbers = #tpu.dot_dimension_numbers<[1], [0], [0], [1], [0, 0, 1, 1], [], []>} : vector<2x12xf32>, vector<12x2xf32>, vector<2x2xf32> -> vector<2x2xf32>
    %304 = vector.broadcast %302 : vector<1x2xf32> to vector<2x2xf32>
    %305 = arith.addf %303, %304 : vector<2x2xf32>
    %cst_141 = arith.constant 0.000000e+00 : f32
    %306 = vector.broadcast %cst_141 : f32 to vector<2x2xf32>
    %307 = arith.maximumf %305, %306 : vector<2x2xf32>
    %c0_142 = arith.constant 0 : index
    %c0_143 = arith.constant 0 : index
    %308 = vector.load %arg10[%c0_142, %c0_143] : memref<2x2xf32, #tpu.memory_space<vmem>>, vector<2x2xf32>
    tpu.vector_store %arg10[%c0_142, %c0_143], %307 {strides = array<i32>} : memref<2x2xf32, #tpu.memory_space<vmem>>, vector<2x2xf32>,
    return
  }
  func.func @transform_0(%arg0: i32) -> (i32, i32) {
    %c0_i32 = arith.constant 0 : i32
    %c0_i32_0 = arith.constant 0 : i32
    return %arg0, %c0_i32 : i32, i32
  }
  func.func @transform_1(%arg0: i32) -> (i32, i32) {
    %c0_i32 = arith.constant 0 : i32
    %c0_i32_0 = arith.constant 0 : i32
    %c0_i32_1 = arith.constant 0 : i32
    return %c0_i32, %c0_i32_0 : i32, i32
  }
  func.func @transform_2(%arg0: i32) -> i32 {
    %c0_i32 = arith.constant 0 : i32
    %c0_i32_0 = arith.constant 0 : i32
    return %c0_i32 : i32
  }
  func.func @transform_3(%arg0: i32) -> (i32, i32) {
    %c0_i32 = arith.constant 0 : i32
    %c0_i32_0 = arith.constant 0 : i32
    %c0_i32_1 = arith.constant 0 : i32
    return %c0_i32, %c0_i32_0 : i32, i32
  }
  func.func @transform_4(%arg0: i32) -> i32 {
    %c0_i32 = arith.constant 0 : i32
    %c0_i32_0 = arith.constant 0 : i32
    return %c0_i32 : i32
  }
  func.func @transform_5(%arg0: i32) -> (i32, i32, i32) {
    %c0_i32 = arith.constant 0 : i32
    %c0_i32_0 = arith.constant 0 : i32
    %c0_i32_1 = arith.constant 0 : i32
    %c0_i32_2 = arith.constant 0 : i32
    return %c0_i32, %c0_i32_0, %c0_i32_1 : i32, i32, i32
  }
  func.func @transform_6(%arg0: i32) -> (i32, i32) {
    %c0_i32 = arith.constant 0 : i32
    %c0_i32_0 = arith.constant 0 : i32
    %c0_i32_1 = arith.constant 0 : i32
    return %c0_i32, %c0_i32_0 : i32, i32
  }
  func.func @transform_7(%arg0: i32) -> (i32, i32) {
    %c0_i32 = arith.constant 0 : i32
    %c0_i32_0 = arith.constant 0 : i32
    %c0_i32_1 = arith.constant 0 : i32
    return %c0_i32, %c0_i32_0 : i32, i32
  }
  func.func @transform_8(%arg0: i32) -> (i32, i32) {
    %c0_i32 = arith.constant 0 : i32
    %c0_i32_0 = arith.constant 0 : i32
    %c0_i32_1 = arith.constant 0 : i32
    return %c0_i32, %c0_i32_0 : i32, i32
  }
  func.func @transform_9(%arg0: i32) -> (i32, i32) {
    %c0_i32 = arith.constant 0 : i32
    %c0_i32_0 = arith.constant 0 : i32
    return %arg0, %c0_i32 : i32, i32
  }
}

</mosaic_0001>

<bundles_post_ra>
// kernel: tpu_custom_call.1
= control target key start
LH: loop header
LB: loop body
LE: loop exit
PB: predicated region body
PF: predicated region fallthrough
CT: control target
= control target key end

     0   :  { %14 = vsyncpa [#allocation4], 0  ;;  %s2231_s0 = inlined_call_operand.vmem [shape: f32[2,1024], index: 0, kind: input, shape index: {}]   ;;  %s2232_s1 = inlined_call_operand.vmem [shape: f32[18,256], index: 1, kind: input, shape index: {}]   ;;  %s2233_s2 = inlined_call_operand.vmem [shape: f32[2], index: 2, kind: input, shape index: {}]   ;;  %s2234_s3 = inlined_call_operand.vmem [shape: f32[36,256], index: 3, kind: input, shape index: {}]   ;;  %s2235_s4 = inlined_call_operand.vmem [shape: f32[2], index: 4, kind: input, shape index: {}]   ;;  %s2236_s5 = inlined_call_operand.vmem [shape: f32[2,256,12], index: 5, kind: input, shape index: {}]   ;;  %s2237_s6 = inlined_call_operand.vmem [shape: f32[1,12], index: 6, kind: input, shape index: {}]   ;;  %s2238_s7 = inlined_call_operand.vmem [shape: f32[12,2], index: 7, kind: input, shape index: {}]   ;;  %s2239_s8 = inlined_call_operand.vmem [shape: f32[1,2], index: 8, kind: input, shape index: {}]   ;;  %s2240_s9 = inlined_call_operand.hbm [shape: f32[2,2], index: 9, kind: output, shape index: {}]  }
   0x1   :  { %15 = vsyncpa [#allocation6], 0 }
   0x2   :  { %16 = vsyncpa [#allocation3], 0  ;;  %s26_s11 = sshll.u32 %s2233_s2, 4  ;;  %s37_s14 = sshll.u32 %s2235_s4, 4  ;;  %s27_s11 = int_to_ptr.vmem [resolvable:$true] %s26_s11  ;;  %s38_s14 = int_to_ptr.vmem [resolvable:$true] %s37_s14 }
   0x3   :  { %s1288_s15 = smov [#allocation2]   ;;  %s1289_s16 = smov [#allocation5]  }
   0x4   :  { %29 = dma.vmem_to_smem %s27_s11, 16, %s1288_s15, [#allocation4]  }
   0x5   :  { %40 = dma.vmem_to_smem %s38_s14, 16, %s1289_s16, [#allocation6]  }
   0x6   :  { %1282 = dma.done.wait [#allocation4], 16  }
   0x7   :  { %1283 = vsyncadd [#allocation4], 4294967280 }
   0x8   :  { %1284 = dma.done.wait [#allocation6], 16  }
   0x9   :  { %1285 = vsyncadd [#allocation6], 4294967280 }
   0xa   :  { %57 = sfence }
   0xb   :  { %v58_v0 = vld [vmem:[%s2231_s0] sm:$0xf]  ;;  %s1290_s2 = smov 17   ;;  %v1116_v3 = vld [vmem:[%s2232_s1 + $0x4] ss:$8 sm:$0x3]  ;;  %v69_v34 = vlaneseq }
   0xc   :  { %60 = vst [vmem:[#allocation1] ss:$4 sm:$0xff] %v58_v0  ;;  %s1291_s20 = smov 16   ;;  %v155_v6 = vperm.slane %v1116_v3, 1  ;;  %v154_v7 = vperm.slane %v1116_v3, 0  ;;  %vm157_vm0 = vcmask 1041408  }
   0xd   :  { %s1292_s0 = smov 15   ;;  %s1293_s21 = smov 1   ;;  %v1125_v19 = vld [vmem:[%s2232_s1 + $0x15] ss:$8 sm:$0x3]  ;;  %v1386_v37 = vand.u32 127, %v69_v34 }
   0xe   :  { %v156_v8 = vrot.slane %v155_v6, 6  ;;  %s1294_s22 = smov 127   ;;  %s1295_s25 = smov 113   ;;  %v313_v22 = vperm.slane %v1125_v19, 1  ;;  %v312_v23 = vperm.slane %v1125_v19, 0  ;;  %vm1068_vm9 = vcmask 1043456  }
   0xf   :  { %s1296_s26 = smov 112   ;;  %s1297_s27 = smov 111   ;;  %v74_v38 = vld [vmem:[%s2232_s1] ss:$8 sm:$0x3]  ;;  %vm71_vm1 = vcmp.lt.s32.totalorder %v1386_v37, 17 }
  0x10   :  { %v158_v11 = vsel %vm157_vm0, %v154_v7, %v156_v8  ;;  %v314_v24 = vrot.slane %v313_v22, 6  ;;  %v1113_v40 = vld [vmem:[%s2232_s1 + $0x1] ss:$8 sm:$0x3]  ;;  %vm91_vm2 = vcmp.lt.s32.totalorder %v1386_v37, 16  ;;  %v76_v41 = vperm.slane %v74_v38, 0 }
  0x11   :  { %v160_v12 = vmul.f32 %v158_v11, %v58_v0  ;;  %v77_v42 = vperm.slane %v74_v38, 1  ;;  %v97_v43 = vperm.slane %v1113_v40, 0  ;;  %v98_v44 = vperm.slane %v1113_v40, 1  ;;  %v1114_v45 = vld [vmem:[%s2232_s1 + $0x2] ss:$8 sm:$0x3] }
  0x12   :  { %v315_v27 = vsel %vm157_vm0, %v312_v23, %v314_v24  ;;  %vm114_vm3 = vcmp.lt.s32.totalorder %v1386_v37, 15  ;;  %v120_v52 = vperm.slane %v1114_v45, 0  ;;  %v121_v53 = vperm.slane %v1114_v45, 1  ;;  %v1115_v58 = vld [vmem:[%s2232_s1 + $0x3] ss:$8 sm:$0x3] }
  0x13   :  { %v61_v1 = vld.sshfl [vmem:[#allocation1] sm:$0xff pattern:$0x73625140]  ;;  %v62_v2 = vld.sshfl [vmem:[#allocation1 + $0x8] sm:$0xff pattern:$0x73625140]  ;;  %v317_v28 = vmul.f32 %v315_v27, %v58_v0 }
  0x14   :  { %65 = vrot.lane.b32.xlu0 %v61_v1, %s1290_s2  ;;  %82 = vst [vmem:[#allocation1] ss:$4 sm:$0xff] %v58_v0  ;;  %vm137_vm4 = vcmp.lt.s32.totalorder %v1386_v37, 1  ;;  %v143_v62 = vperm.slane %v1115_v58, 0  ;;  %v144_v63 = vperm.slane %v1115_v58, 1  ;;  %vm178_vm5 = vcmp.lt.s32.totalorder %v1386_v37, 127 }
  0x15   :  { %v1117_v8 = vld [vmem:[%s2232_s1 + $0x5] ss:$8 sm:$0x3]  ;;  %vm201_vm6 = vcmp.lt.s32.totalorder %v1386_v37, 113  ;;  %vm224_vm7 = vcmp.lt.s32.totalorder %v1386_v37, 112  ;;  %s261_s28 = sld [smem:[#allocation2]] }
  0x16   :  { %v1119_v22 = vld [vmem:[%s2232_s1 + $0x7] ss:$8 sm:$0x3]  ;;  %v1120_v34 = vld [vmem:[%s2232_s1 + $0x10] ss:$8 sm:$0x3] }
  0x17   :  { %vm247_vm8 = vcmp.lt.s32.totalorder %v1386_v37, 111  ;;  %s1130_s29 = sld [smem:[#allocation2 + $0x1]]  ;;  %vm1064_vm10 = vcmask 97280   ;;  %s1102_s15 = sshll.u32 %s2240_s9, 4  ;;  %vm1093_vm11 = vcmask 9216   ;;  %s1103_s15 = int_to_ptr.hbm [resolvable:$true] %s1102_s15 }
  0x1b   :  { %v83_v4 = vld.sshfl [vmem:[#allocation1] sm:$0xff pattern:$0x73625140]  ;;  %v84_v5 = vld.sshfl [vmem:[#allocation1 + $0x8] sm:$0xff pattern:$0x73625140] }
  0x1c   :  { %87 = vrot.lane.b32.xlu1 %v83_v4, %s1291_s20  ;;  %67 = vrot.lane.b32.xlu0 %v62_v2, %s1290_s2  ;;  %105 = vst [vmem:[#allocation1] ss:$4 sm:$0xff] %v58_v0 }
  0x23   :  { %v106_v9 = vld.sshfl [vmem:[#allocation1] sm:$0xff pattern:$0x73625140]  ;;  %v107_v10 = vld.sshfl [vmem:[#allocation1 + $0x8] sm:$0xff pattern:$0x73625140] }
  0x24   :  { %89 = vrot.lane.b32.xlu1 %v84_v5, %s1291_s20  ;;  %128 = vst [vmem:[#allocation1] ss:$4 sm:$0xff] %v58_v0  ;;  %110 = vrot.lane.b32.xlu2 %v106_v9, %s1292_s0 }
  0x2b   :  { %v130_v13 = vld.sshfl [vmem:[#allocation1 + $0x8] sm:$0xff pattern:$0x73625140]  ;;  %v129_v14 = vld.sshfl [vmem:[#allocation1] sm:$0xff pattern:$0x73625140] }
  0x2c   :  { %135 = vrot.lane.b32.xlu1 %v130_v13, %s1293_s21  ;;  %133 = vrot.lane.b32.xlu0 %v129_v14, %s1293_s21  ;;  %162 = vst [vmem:[#allocation1] ss:$4 sm:$0xff] %v160_v12  ;;  %v1118_v13 = vld [vmem:[%s2232_s1 + $0x6] ss:$8 sm:$0x3]  ;;  %v184_v14 = vperm.slane %v1117_v8, 0 }
  0x2d   :  { %112 = vrot.lane.b32.xlu2 %v107_v10, %s1292_s0 }
  0x33   :  { %v1370_v15 = vld.sshfl [vmem:[#allocation1] sm:$0xff pattern:$0x73625140]  ;;  %v1372_v16 = vld.sshfl [vmem:[#allocation1 + $0x8] sm:$0xff pattern:$0x73625140] }
  0x34   :  { %169 = vst [vmem:[#allocation1] ss:$4 sm:$0xff] %v58_v0 }
  0x3b   :  { %v171_v17 = vld.sshfl [vmem:[#allocation1 + $0x8] sm:$0xff pattern:$0x73625140]  ;;  %v170_v18 = vld.sshfl [vmem:[#allocation1] sm:$0xff pattern:$0x73625140] }
  0x3c   :  { %176 = vrot.lane.b32.xlu0 %v171_v17, %s1294_s22  ;;  %192 = vst [vmem:[#allocation1] ss:$4 sm:$0xff] %v58_v0  ;;  %174 = vrot.lane.b32.xlu2 %v170_v18, %s1294_s22  ;;  %v185_v17 = vperm.slane %v1117_v8, 1 }
  0x43   :  { %v193_v20 = vld.sshfl [vmem:[#allocation1] sm:$0xff pattern:$0x73625140]  ;;  %v194_v21 = vld.sshfl [vmem:[#allocation1 + $0x8] sm:$0xff pattern:$0x73625140] }
  0x44   :  { %197 = vrot.lane.b32.xlu1 %v193_v20, %s1295_s25  ;;  %215 = vst [vmem:[#allocation1] ss:$4 sm:$0xff] %v58_v0  ;;  %199 = vrot.lane.b32.xlu2 %v194_v21, %s1295_s25  ;;  %v207_v21 = vperm.slane %v1118_v13, 0 }
  0x4b   :  { %v217_v25 = vld.sshfl [vmem:[#allocation1 + $0x8] sm:$0xff pattern:$0x73625140]  ;;  %v216_v26 = vld.sshfl [vmem:[#allocation1] sm:$0xff pattern:$0x73625140] }
  0x4c   :  { %222 = vrot.lane.b32.xlu1 %v217_v25, %s1296_s26  ;;  %220 = vrot.lane.b32.xlu0 %v216_v26, %s1296_s26  ;;  %238 = vst [vmem:[#allocation1] ss:$4 sm:$0xff] %v58_v0  ;;  %v208_v25 = vperm.slane %v1118_v13, 1  ;;  %v1123_v13 = vld [vmem:[%s2232_s1 + $0x13] ss:$8 sm:$0x3] }
  0x53   :  { %v240_v29 = vld.sshfl [vmem:[#allocation1 + $0x8] sm:$0xff pattern:$0x73625140]  ;;  %v239_v30 = vld.sshfl [vmem:[#allocation1] sm:$0xff pattern:$0x73625140] }
  0x54   :  { %245 = vrot.lane.b32.xlu0 %v240_v29, %s1297_s27  ;;  %243 = vrot.lane.b32.xlu2 %v239_v30, %s1297_s27  ;;  %319 = vst [vmem:[#allocation1] ss:$4 sm:$0xff] %v317_v28 }
  0x7e   :  { %v111_v33 = vpop.permute.xlu2 %110 }
  0x86   :  { %v66_v31 = vpop.permute.xlu0 %65 }
  0x87   :  { %v113_v39 = vpop.permute.xlu2 %112 }
  0x88   :  { %v1425_v60 = vsel %vm114_vm3, %v111_v33, %v113_v39  ;;  %v1429_v61 = vsel %vm114_vm3, %v113_v39, %v111_v33  ;;  %v231_v33 = vperm.slane %v1119_v22, 1 }
  0x89   :  { %v124_v2 = vmul.f32 %v120_v52, %v1429_v61  ;;  %v125_v3 = vmul.f32 %v121_v53, %v1425_v60 }
  0x8e   :  { %v88_v32 = vpop.permute.xlu1 %87  ;;  %v68_v35 = vpop.permute.xlu0 %67 }
  0x8f   :  { %v1401_v48 = vsel %vm71_vm1, %v66_v31, %v68_v35  ;;  %v1405_v49 = vsel %vm71_vm1, %v68_v35, %v66_v31 }
  0x90   :  { %v80_v54 = vmul.f32 %v76_v41, %v1405_v49  ;;  %v81_v55 = vmul.f32 %v77_v42, %v1401_v48  ;;  %v253_v42 = vperm.slane %v1120_v34, 0 }
  0x96   :  { %v90_v36 = vpop.permute.xlu1 %89  ;;  %v175_v59 = vpop.permute.xlu2 %174 }
  0x97   :  { %v1409_v50 = vsel %vm91_vm2, %v88_v32, %v90_v36  ;;  %v1413_v51 = vsel %vm91_vm2, %v90_v36, %v88_v32  ;;  %v230_v32 = vperm.slane %v1119_v22, 0 }
  0x98   :  { %v101_v56 = vmul.f32 %v97_v43, %v1413_v51  ;;  %v102_v57 = vmul.f32 %v98_v44, %v1409_v50  ;;  %v254_v43 = vperm.slane %v1120_v34, 1 }
  0x9a   :  { %v103_v0 = vadd.f32 %v101_v56, %v80_v54  ;;  %v104_v1 = vadd.f32 %v102_v57, %v81_v55 }
  0x9c   :  { %v126_v9 = vadd.f32 %v124_v2, %v103_v0  ;;  %v127_v10 = vadd.f32 %v125_v3, %v104_v1  ;;  %v1121_v3 = vld [vmem:[%s2232_s1 + $0x11] ss:$8 sm:$0x3] }
  0x9e   :  { %v136_v46 = vpop.permute.xlu1 %135  ;;  %v134_v47 = vpop.permute.xlu0 %133 }
  0x9f   :  { %v1436_v6 = vsel %vm137_vm4, %v134_v47, %v136_v46  ;;  %v1440_v7 = vsel %vm137_vm4, %v136_v46, %v134_v47  ;;  %v200_v18 = vpop.permute.xlu2 %199 }
  0xa0   :  { %v147_v11 = vmul.f32 %v143_v62, %v1440_v7  ;;  %v148_v12 = vmul.f32 %v144_v63, %v1436_v6  ;;  %v262_v62 = vstv %s261_s28 }
  0xa2   :  { %v149_v23 = vadd.f32 %v147_v11, %v126_v9  ;;  %v150_v24 = vadd.f32 %v148_v12, %v127_v10  ;;  %v270_v9 = vperm.slane %v1121_v3, 0  ;;  %v271_v10 = vperm.slane %v1121_v3, 1 }
  0xa4   :  { %v168_v38 = vadd.f32 %v1372_v16, %v150_v24  ;;  %v167_v39 = vadd.f32 %v1370_v15, %v149_v23  ;;  %v1124_v24 = vld [vmem:[%s2232_s1 + $0x14] ss:$8 sm:$0x3] }
  0xae   :  { %v177_v4 = vpop.permute.xlu0 %176  ;;  %v244_v52 = vpop.permute.xlu2 %243 }
  0xaf   :  { %v1454_v19 = vsel %vm178_vm5, %v175_v59, %v177_v4  ;;  %v1458_v20 = vsel %vm178_vm5, %v177_v4, %v175_v59  ;;  %v1122_v4 = vld [vmem:[%s2232_s1 + $0x12] ss:$8 sm:$0x3] }
  0xb0   :  { %v188_v30 = vmul.f32 %v184_v14, %v1454_v19  ;;  %v189_v31 = vmul.f32 %v185_v17, %v1458_v20  ;;  %v279_v11 = vperm.slane %v1122_v4, 0  ;;  %v280_v12 = vperm.slane %v1122_v4, 1 }
  0xb1   :  { %v290_v14 = vperm.slane %v1123_v13, 0  ;;  %v291_v17 = vperm.slane %v1123_v13, 1 }
  0xb2   :  { %v190_v44 = vadd.f32 %v188_v30, %v167_v39  ;;  %v191_v45 = vadd.f32 %v189_v31, %v168_v38  ;;  %v283_v22 = vmul.f32 %v279_v11, %v1413_v51  ;;  %v284_v23 = vmul.f32 %v280_v12, %v1409_v50  ;;  %v1126_v50 = vld [vmem:[%s2232_s1 + $0x16] ss:$8 sm:$0x3] }
  0xb3   :  { %v295_v51 = vmul.f32 %v291_v17, %v1425_v60  ;;  %v329_v34 = vperm.slane %v1126_v50, 0  ;;  %v330_v38 = vperm.slane %v1126_v50, 1  ;;  %v1643_v50 = vld [vmem:[%s2234_s3 + $0x22] ss:$8 sm:$0x3] }
  0xb6   :  { %v198_v5 = vpop.permute.xlu1 %197 }
  0xb7   :  { %v1466_v28 = vsel %vm201_vm6, %v198_v5, %v200_v18  ;;  %v1470_v29 = vsel %vm201_vm6, %v200_v18, %v198_v5  ;;  %v274_v18 = vmul.f32 %v270_v9, %v1405_v49 }
  0xb8   :  { %v211_v40 = vmul.f32 %v207_v21, %v1466_v28  ;;  %v212_v41 = vmul.f32 %v208_v25, %v1470_v29  ;;  %v275_v21 = vmul.f32 %v271_v10, %v1401_v48  ;;  %v301_v25 = vperm.slane %v1124_v24, 0 }
  0xb9   :  { %v294_v48 = vmul.f32 %v290_v14, %v1429_v61  ;;  %v1127_v61 = vld [vmem:[%s2232_s1 + $0x17] ss:$8 sm:$0x3] }
  0xba   :  { %v213_v53 = vadd.f32 %v211_v40, %v190_v44  ;;  %v214_v54 = vadd.f32 %v212_v41, %v191_v45  ;;  %v286_v49 = vadd.f32 %v284_v23, %v275_v21  ;;  %v320_v40 = vld.sshfl [vmem:[#allocation1] sm:$0xff pattern:$0x73625140]  ;;  %v340_v41 = vperm.slane %v1127_v61, 0 }
  0xbb   :  { %v1129_v44 = vld [vmem:[%s2232_s1 + $0x21] ss:$8 sm:$0x3]  ;;  %v334_v45 = vmul.f32 %v330_v38, %v1458_v20 }
  0xbc   :  { %v297_v31 = vadd.f32 %v295_v51, %v286_v49 }
  0xbe   :  { %v223_v26 = vpop.permute.xlu1 %222  ;;  %v221_v27 = vpop.permute.xlu0 %220 }
  0xbf   :  { %v1479_v35 = vsel %vm224_vm7, %v221_v27, %v223_v26  ;;  %v1483_v36 = vsel %vm224_vm7, %v223_v26, %v221_v27  ;;  %v302_v26 = vperm.slane %v1124_v24, 1  ;;  %v285_v27 = vadd.f32 %v283_v22, %v274_v18  ;;  %v1134_v22 = vld [vmem:[%s2234_s3 + $0x4] ss:$8 sm:$0x3] }
  0xc0   :  { %v234_v46 = vmul.f32 %v230_v32, %v1479_v35  ;;  %v235_v47 = vmul.f32 %v231_v33, %v1483_v36  ;;  %v305_v32 = vmul.f32 %v301_v25, %v1440_v7  ;;  %v1128_v7 = vld [vmem:[%s2232_s1 + $0x20] ss:$8 sm:$0x3]  ;;  %v1152_v24 = vld [vmem:[%s2234_s3 + $0x26] ss:$8 sm:$0x3] }
  0xc1   :  { %v296_v30 = vadd.f32 %v294_v48, %v285_v27  ;;  %v306_v33 = vmul.f32 %v302_v26, %v1436_v6  ;;  %v321_v6 = vld.sshfl [vmem:[#allocation1 + $0x8] sm:$0xff pattern:$0x73625140]  ;;  %v444_v25 = vperm.slane %v1134_v22, 0  ;;  %v445_v49 = vperm.slane %v1134_v22, 1 }
  0xc2   :  { %v236_v56 = vadd.f32 %v234_v46, %v213_v53  ;;  %v237_v57 = vadd.f32 %v235_v47, %v214_v54  ;;  %v351_v46 = vperm.slane %v1128_v7, 0  ;;  %v352_v47 = vperm.slane %v1128_v7, 1  ;;  %v1635_v26 = vld [vmem:[%s2234_s3 + $0x15] ss:$8 sm:$0x3] }
  0xc3   :  { %v307_v60 = vadd.f32 %v305_v32, %v296_v30  ;;  %v308_v39 = vadd.f32 %v306_v33, %v297_v31  ;;  %v344_v54 = vmul.f32 %v340_v41, %v1466_v28  ;;  %v382_v27 = vld [vmem:[%s2234_s3] ss:$8 sm:$0x3]  ;;  %v766_v48 = vperm.slane %v1152_v24, 0 }
  0xc4   :  { %v767_v51 = vperm.slane %v1152_v24, 1  ;;  %v1650_v31 = vld [vmem:[%s2234_s3 + $0x2] ss:$8 sm:$0x3] }
  0xc5   :  { %v325_v53 = vadd.f32 %v321_v6, %v308_v39  ;;  %v1655_v32 = vld [vmem:[%s2234_s3 + $0x24] ss:$8 sm:$0x3]  ;;  %v1131_v33 = vld [vmem:[%s2234_s3 + $0x1] ss:$8 sm:$0x3] }
  0xc6   :  { %v246_v16 = vpop.permute.xlu0 %245  ;;  %v724_v39 = vperm.slane %v1643_v50, 0  ;;  %v416_v7 = vperm.slane %v1650_v31, 0  ;;  %v1149_v6 = vld [vmem:[%s2234_s3 + $0x23] ss:$8 sm:$0x3] }
  0xc7   :  { %v1494_v15 = vsel %vm247_vm8, %v244_v52, %v246_v16  ;;  %v1498_v55 = vsel %vm247_vm8, %v246_v16, %v244_v52  ;;  %v324_v52 = vadd.f32 %v320_v40, %v307_v60  ;;  %v725_v40 = vperm.slane %v1643_v50, 1  ;;  %v1740_v50 = vld [vmem:[%s2234_s3 + $0x7] ss:$8 sm:$0x3] }
  0xc8   :  { %v257_v58 = vmul.f32 %v253_v42, %v1494_v15  ;;  %v258_v59 = vmul.f32 %v254_v43, %v1498_v55  ;;  %v341_v42 = vperm.slane %v1127_v61, 1  ;;  %v333_v43 = vmul.f32 %v329_v34, %v1454_v19 }
  0xc9   :  { %v355_v19 = vmul.f32 %v351_v46, %v1479_v35  ;;  %v384_v34 = vperm.slane %v382_v27, 0  ;;  %v385_v61 = vperm.slane %v382_v27, 1  ;;  %v496_v60 = vperm.slane %v1740_v50, 1 }
  0xca   :  { %v259_v63 = vadd.f32 %v257_v58, %v236_v56  ;;  %v260_v0 = vadd.f32 %v258_v59, %v237_v57  ;;  %v345_v16 = vmul.f32 %v341_v42, %v1470_v29  ;;  %v362_v56 = vperm.slane %v1129_v44, 0 }
  0xcb   :  { %v363_v57 = vperm.slane %v1129_v44, 1  ;;  %v335_v58 = vadd.f32 %v333_v43, %v324_v52  ;;  %v336_v59 = vadd.f32 %v334_v45, %v325_v53  ;;  %v417_v42 = vperm.slane %v1650_v31, 1  ;;  %v1133_v45 = vld [vmem:[%s2234_s3 + $0x3] ss:$8 sm:$0x3] }
  0xcc   :  { %v263_v1 = vadd.f32 %v262_v62, %v259_v63  ;;  %v264_v2 = vadd.f32 %v262_v62, %v260_v0  ;;  %v356_v62 = vmul.f32 %v352_v47, %v1483_v36  ;;  %v366_v29 = vmul.f32 %v362_v56, %v1494_v15  ;;  %v1680_v47 = vld [vmem:[%s2234_s3 + $0x25] ss:$8 sm:$0x3]  ;;  %v1685_v52 = vld [vmem:[%s2234_s3 + $0x6] ss:$8 sm:$0x3] }
  0xcd   :  { %v346_v20 = vadd.f32 %v344_v54, %v335_v58  ;;  %v347_v28 = vadd.f32 %v345_v16, %v336_v59  ;;  %v367_v63 = vmul.f32 %v363_v57, %v1498_v55  ;;  %v371_v36 = vstv %s1130_s29 }
  0xce   :  { %v1508_v5 = vmax.f32 %v263_v1, 0.0  ;;  %v1510_v8 = vmax.f32 %v264_v2, 0.0  ;;  %v744_v43 = vperm.slane %v1655_v32, 0  ;;  %v400_v44 = vperm.slane %v1131_v33, 1 }
  0xcf   :  { %v357_v0 = vadd.f32 %v355_v19, %v346_v20  ;;  %v358_v1 = vadd.f32 %v356_v62, %v347_v28  ;;  %v745_v57 = vperm.slane %v1655_v32, 1  ;;  %v399_v58 = vperm.slane %v1131_v33, 0  ;;  %v1705_v62 = vld [vmem:[%s2234_s3 + $0x30] ss:$8 sm:$0x3] }
  0xd0   :  { %378 = vrot.lane.b32.xlu2 %v1510_v8, %s1290_s2  ;;  %390 = vrot.lane.b32.xlu0 %v1508_v5, %s1291_s20  ;;  %v1688_v53 = vmul.f32 %v445_v49, %v1510_v8  ;;  %v1691_v54 = vmul.f32 %v767_v51, %v1510_v8  ;;  %v1694_v16 = vmul.f32 %v444_v25, %v1508_v5  ;;  %v733_v59 = vperm.slane %v1149_v6, 0  ;;  %v1138_v32 = vld [vmem:[%s2234_s3 + $0x10] ss:$8 sm:$0x3] }
  0xd1   :  { %376 = vrot.lane.b32.xlu1 %v1508_v5, %s1290_s2  ;;  %v368_v35 = vadd.f32 %v366_v29, %v357_v0  ;;  %v369_v2 = vadd.f32 %v367_v63, %v358_v1  ;;  %v1697_v56 = vmul.f32 %v766_v48, %v1508_v5  ;;  %v433_v28 = vperm.slane %v1133_v45, 0 }
  0xd2   :  { %v434_v29 = vperm.slane %v1133_v45, 1  ;;  %v755_v0 = vperm.slane %v1680_v47, 0  ;;  %v756_v1 = vperm.slane %v1680_v47, 1  ;;  %v789_v24 = vperm.slane %v1705_v62, 1 }
  0xd3   :  { %v372_v3 = vadd.f32 %v371_v36, %v368_v35  ;;  %v373_v4 = vadd.f32 %v371_v36, %v369_v2  ;;  %v478_v35 = vperm.slane %v1685_v52, 0  ;;  %v1722_v2 = vld [vmem:[%s2234_s3 + $0x27] ss:$8 sm:$0x3] }
  0xd4   :  { %v777_v51 = vperm.slane %v1722_v2, 0  ;;  %v1753_v45 = vld [vmem:[%s2234_s3 + $0x31] ss:$8 sm:$0x3] }
  0xd5   :  { %v1576_v9 = vmax.f32 %v372_v3, 0.0  ;;  %v1578_v15 = vmax.f32 %v373_v4, 0.0  ;;  %v479_v4 = vperm.slane %v1685_v52, 1 }
  0xd8   :  { %407 = vrot.lane.b32.xlu2 %v1508_v5, %s1292_s0  ;;  %409 = vrot.lane.b32.xlu0 %v1510_v8, %s1292_s0 }
  0xd9   :  { %392 = vrot.lane.b32.xlu1 %v1510_v8, %s1291_s20 }
  0xe0   :  { %426 = vrot.lane.b32.xlu2 %v1510_v8, %s1293_s21  ;;  %452 = vrot.lane.b32.xlu0 %v1508_v5, %s1294_s22 }
  0xe1   :  { %424 = vrot.lane.b32.xlu1 %v1508_v5, %s1293_s21 }
  0xe8   :  { %469 = vrot.lane.b32.xlu2 %v1508_v5, %s1295_s25  ;;  %471 = vrot.lane.b32.xlu0 %v1510_v8, %s1295_s25 }
  0xe9   :  { %454 = vrot.lane.b32.xlu1 %v1510_v8, %s1294_s22 }
  0xf0   :  { %488 = vrot.lane.b32.xlu2 %v1510_v8, %s1296_s26  ;;  %503 = vrot.lane.b32.xlu0 %v1508_v5, %s1297_s27 }
  0xf1   :  { %486 = vrot.lane.b32.xlu1 %v1508_v5, %s1296_s26  ;;  %v1712_v5 = vld [vmem:[%s2234_s3 + $0x5] ss:$8 sm:$0x3] }
  0xf2   :  { %v461_v25 = vperm.slane %v1712_v5, 0  ;;  %v462_v27 = vperm.slane %v1712_v5, 1  ;;  %v495_v5 = vperm.slane %v1740_v50, 0 }
  0xf8   :  { %520 = vrot.lane.b32.xlu2 %v1576_v9, %s1290_s2  ;;  %522 = vrot.lane.b32.xlu0 %v1578_v15, %s1290_s2  ;;  %s1945_s2 = sld [smem:[#allocation5 + $0x1]] }
  0xf9   :  { %505 = vrot.lane.b32.xlu1 %v1510_v8, %s1297_s27  ;;  %v734_v8 = vperm.slane %v1149_v6, 1 }
 0x100   :  { %539 = vrot.lane.b32.xlu2 %v1578_v15, %s1291_s20  ;;  %554 = vrot.lane.b32.xlu0 %v1576_v9, %s1292_s0 }
 0x101   :  { %537 = vrot.lane.b32.xlu1 %v1576_v9, %s1291_s20 }
 0x108   :  { %571 = vrot.lane.b32.xlu2 %v1576_v9, %s1293_s21  ;;  %573 = vrot.lane.b32.xlu0 %v1578_v15, %s1293_s21  ;;  %s1950_s21 = sld [smem:[#allocation5]] }
 0x109   :  { %556 = vrot.lane.b32.xlu1 %v1578_v15, %s1292_s0 }
 0x110   :  { %601 = vrot.lane.b32.xlu2 %v1578_v15, %s1294_s22  ;;  %616 = vrot.lane.b32.xlu0 %v1576_v9, %s1295_s25 }
 0x111   :  { %599 = vrot.lane.b32.xlu1 %v1576_v9, %s1294_s22 }
 0x118   :  { %633 = vrot.lane.b32.xlu2 %v1576_v9, %s1296_s26  ;;  %635 = vrot.lane.b32.xlu0 %v1578_v15, %s1296_s26 }
 0x119   :  { %618 = vrot.lane.b32.xlu1 %v1578_v15, %s1295_s25 }
 0x120   :  { %652 = vrot.lane.b32.xlu2 %v1578_v15, %s1297_s27 }
 0x121   :  { %650 = vrot.lane.b32.xlu1 %v1576_v9, %s1297_s27 }
 0x12a   :  { %v379_v55 = vpop.permute.xlu2 %378 }
 0x132   :  { %v1614_v10 = vpop.permute.xlu2 %407 }
 0x13a   :  { %v1616_v12 = vpop.permute.xlu2 %426 }
 0x142   :  { %v391_v11 = vpop.permute.xlu0 %390  ;;  %v1620_v18 = vpop.permute.xlu2 %469 }
 0x143   :  { %v377_v13 = vpop.permute.xlu1 %376 }
 0x144   :  { %v380_v63 = vsel %vm71_vm1, %v377_v13, %v379_v55  ;;  %v381_v36 = vsel %vm71_vm1, %v379_v55, %v377_v13  ;;  %v778_v55 = vperm.slane %v1722_v2, 1 }
 0x145   :  { %v389_v49 = vmul.f32 %v385_v61, %v380_v63  ;;  %v388_v33 = vmul.f32 %v384_v34, %v381_v36 }
 0x14a   :  { %v1618_v14 = vpop.permute.xlu0 %409  ;;  %v1645_v30 = vpop.permute.xlu2 %488 }
 0x14b   :  { %v393_v17 = vpop.permute.xlu1 %392  ;;  %v411_v6 = vsel %vm114_vm3, %v1614_v10, %v1618_v14  ;;  %v412_v34 = vsel %vm114_vm3, %v1618_v14, %v1614_v10  ;;  %v799_v14 = vperm.slane %v1753_v45, 0 }
 0x14c   :  { %v394_v19 = vsel %vm91_vm2, %v391_v11, %v393_v17  ;;  %v395_v20 = vsel %vm91_vm2, %v393_v17, %v391_v11  ;;  %v788_v11 = vperm.slane %v1705_v62, 0  ;;  %v1159_v62 = vld [vmem:[%s2234_s3 + $0x35] ss:$8 sm:$0x3] }
 0x14d   :  { %v404_v3 = vmul.f32 %v400_v44, %v394_v19  ;;  %v403_v17 = vmul.f32 %v399_v58, %v395_v20  ;;  %v737_v48 = vmul.f32 %v733_v59, %v395_v20  ;;  %v738_v44 = vmul.f32 %v734_v8, %v394_v19 }
 0x14e   :  { %v728_v58 = vmul.f32 %v724_v39, %v381_v36  ;;  %v729_v8 = vmul.f32 %v725_v40, %v380_v63  ;;  %v1768_v39 = vld [vmem:[%s2234_s3 + $0x11] ss:$8 sm:$0x3]  ;;  %v421_v36 = vmul.f32 %v417_v42, %v411_v6  ;;  %v800_v40 = vperm.slane %v1753_v45, 1 }
 0x14f   :  { %v406_v59 = vadd.f32 %v404_v3, %v389_v49  ;;  %v405_v20 = vadd.f32 %v403_v17, %v388_v33  ;;  %v420_v3 = vmul.f32 %v416_v7, %v412_v34  ;;  %v748_v63 = vmul.f32 %v744_v43, %v412_v34  ;;  %v1780_v42 = vld [vmem:[%s2234_s3 + $0x33] ss:$8 sm:$0x3] }
 0x150   :  { %v739_v38 = vadd.f32 %v737_v48, %v728_v58  ;;  %v529_v33 = vperm.slane %v1768_v39, 0  ;;  %v822_v34 = vperm.slane %v1780_v42, 1 }
 0x151   :  { %v423_v17 = vadd.f32 %v421_v36, %v406_v59  ;;  %v422_v48 = vadd.f32 %v420_v3, %v405_v20  ;;  %v513_v20 = vperm.slane %v1138_v32, 1 }
 0x152   :  { %v1622_v21 = vpop.permute.xlu0 %452  ;;  %v1728_v22 = vpop.permute.xlu2 %520  ;;  %v750_v43 = vadd.f32 %v748_v63, %v739_v38  ;;  %v821_v38 = vperm.slane %v1780_v42, 0  ;;  %v1160_v42 = vld [vmem:[%s2234_s3 + $0x36] ss:$8 sm:$0x3] }
 0x153   :  { %v1627_v23 = vpop.permute.xlu1 %424 }
 0x154   :  { %v428_v61 = vsel %vm137_vm4, %v1627_v23, %v1616_v12  ;;  %v429_v19 = vsel %vm137_vm4, %v1616_v12, %v1627_v23  ;;  %v740_v12 = vadd.f32 %v738_v44, %v729_v8  ;;  %v512_v8 = vperm.slane %v1138_v32, 0 }
 0x155   :  { %v438_v10 = vmul.f32 %v434_v29, %v428_v61  ;;  %v437_v23 = vmul.f32 %v433_v28, %v429_v19  ;;  %v759_v49 = vmul.f32 %v755_v0, %v429_v19  ;;  %v749_v29 = vmul.f32 %v745_v57, %v411_v6 }
 0x156   :  { %v760_v31 = vmul.f32 %v756_v1, %v428_v61  ;;  %v530_v57 = vperm.slane %v1768_v39, 1  ;;  %v1156_v1 = vld [vmem:[%s2234_s3 + $0x32] ss:$8 sm:$0x3] }
 0x157   :  { %v440_v28 = vadd.f32 %v438_v10, %v423_v17  ;;  %v751_v44 = vadd.f32 %v749_v29, %v740_v12  ;;  %v439_v61 = vadd.f32 %v437_v23, %v422_v48  ;;  %v810_v3 = vperm.slane %v1156_v1, 0  ;;  %v1814_v48 = vld [vmem:[%s2234_s3 + $0x34] ss:$8 sm:$0x3] }
 0x158   :  { %v811_v12 = vperm.slane %v1156_v1, 1  ;;  %v833_v1 = vperm.slane %v1814_v48, 1  ;;  %v1142_v39 = vld [vmem:[%s2234_s3 + $0x14] ss:$8 sm:$0x3] }
 0x159   :  { %v762_v36 = vadd.f32 %v760_v31, %v751_v44  ;;  %v451_v23 = vadd.f32 %v1688_v53, %v440_v28 }
 0x15a   :  { %v1668_v41 = vpop.permute.xlu0 %471  ;;  %v1799_v58 = vpop.permute.xlu2 %539 }
 0x15b   :  { %v1675_v46 = vpop.permute.xlu1 %454 }
 0x15c   :  { %v457_v7 = vsel %vm178_vm5, %v1675_v46, %v1622_v21  ;;  %v456_v0 = vsel %vm178_vm5, %v1622_v21, %v1675_v46  ;;  %v1806_v21 = vld [vmem:[%s2234_s3 + $0x12] ss:$8 sm:$0x3]  ;;  %v761_v46 = vadd.f32 %v759_v49, %v750_v43  ;;  %v473_v49 = vsel %vm201_vm6, %v1620_v18, %v1668_v41 }
 0x15d   :  { %v466_v19 = vmul.f32 %v462_v27, %v457_v7  ;;  %v465_v10 = vmul.f32 %v461_v25, %v456_v0  ;;  %v781_v63 = vmul.f32 %v777_v51, %v456_v0  ;;  %v546_v17 = vperm.slane %v1806_v21, 0 }
 0x15e   :  { %v547_v29 = vperm.slane %v1806_v21, 1  ;;  %v474_v27 = vsel %vm201_vm6, %v1668_v41, %v1620_v18  ;;  %v450_v25 = vadd.f32 %v1694_v16, %v439_v61  ;;  %v782_v53 = vmul.f32 %v778_v55, %v457_v7 }
 0x15f   :  { %v468_v31 = vadd.f32 %v466_v19, %v451_v23  ;;  %v772_v32 = vadd.f32 %v1697_v56, %v761_v46  ;;  %v773_v16 = vadd.f32 %v1691_v54, %v762_v36  ;;  %v832_v7 = vperm.slane %v1814_v48, 0 }
 0x160   :  { %v467_v2 = vadd.f32 %v465_v10, %v450_v25  ;;  %v483_v28 = vmul.f32 %v479_v4, %v474_v27  ;;  %v1141_v4 = vld [vmem:[%s2234_s3 + $0x13] ss:$8 sm:$0x3] }
 0x161   :  { %v783_v18 = vadd.f32 %v781_v63, %v772_v32  ;;  %v784_v54 = vadd.f32 %v782_v53, %v773_v16  ;;  %v563_v23 = vperm.slane %v1141_v4, 0 }
 0x162   :  { %v1735_v13 = vpop.permute.xlu0 %503  ;;  %v485_v61 = vadd.f32 %v483_v28, %v468_v31  ;;  %v572_v50 = vpop.permute.xlu2 %571  ;;  %v844_v31 = vperm.slane %v1159_v62, 1 }
 0x163   :  { %v487_v47 = vpop.permute.xlu1 %486 }
 0x164   :  { %v491_v51 = vsel %vm224_vm7, %v1645_v30, %v487_v47  ;;  %v490_v43 = vsel %vm224_vm7, %v487_v47, %v1645_v30  ;;  %v482_v30 = vmul.f32 %v478_v35, %v473_v49  ;;  %v793_v35 = vmul.f32 %v789_v24, %v474_v27 }
 0x165   :  { %v500_v41 = vmul.f32 %v496_v60, %v491_v51  ;;  %v499_v47 = vmul.f32 %v495_v5, %v490_v43  ;;  %v792_v60 = vmul.f32 %v788_v11, %v473_v49  ;;  %v843_v49 = vperm.slane %v1159_v62, 0 }
 0x166   :  { %v484_v5 = vadd.f32 %v482_v30, %v467_v2  ;;  %v795_v63 = vadd.f32 %v793_v35, %v784_v54  ;;  %v581_v30 = vperm.slane %v1142_v39, 1 }
 0x167   :  { %v502_v19 = vadd.f32 %v500_v41, %v485_v61  ;;  %v794_v36 = vadd.f32 %v792_v60, %v783_v18  ;;  %v854_v60 = vperm.slane %v1160_v42, 0 }
 0x168   :  { %v501_v11 = vadd.f32 %v499_v47, %v484_v5  ;;  %v1161_v47 = vld [vmem:[%s2234_s3 + $0x37] ss:$8 sm:$0x3]  ;;  %v1162_v5 = vld [vmem:[%s2234_s3 + $0x40] ss:$8 sm:$0x3] }
 0x16a   :  { %v1794_v6 = vpop.permute.xlu0 %522  ;;  %v602_v18 = vpop.permute.xlu2 %601 }
 0x16b   :  { %v506_v59 = vpop.permute.xlu1 %505  ;;  %v525_v45 = vsel %vm71_vm1, %v1794_v6, %v1728_v22 }
 0x16c   :  { %v508_v55 = vsel %vm247_vm8, %v506_v59, %v1735_v13  ;;  %v507_v56 = vsel %vm247_vm8, %v1735_v13, %v506_v59  ;;  %v803_v13 = vmul.f32 %v799_v14, %v490_v43  ;;  %v804_v59 = vmul.f32 %v800_v40, %v491_v51 }
 0x16d   :  { %v517_v52 = vmul.f32 %v513_v20, %v508_v55  ;;  %v516_v46 = vmul.f32 %v512_v8, %v507_v56  ;;  %v814_v10 = vmul.f32 %v810_v3, %v507_v56  ;;  %v524_v14 = vsel %vm71_vm1, %v1728_v22, %v1794_v6 }
 0x16e   :  { %v815_v20 = vmul.f32 %v811_v12, %v508_v55  ;;  %v805_v24 = vadd.f32 %v803_v13, %v794_v36  ;;  %v564_v8 = vperm.slane %v1141_v4, 1  ;;  %v806_v3 = vadd.f32 %v804_v59, %v795_v63 }
 0x16f   :  { %v519_v40 = vadd.f32 %v517_v52, %v502_v19  ;;  %v518_v48 = vadd.f32 %v516_v46, %v501_v11  ;;  %v534_v25 = vmul.f32 %v530_v57, %v524_v14  ;;  %v533_v22 = vmul.f32 %v529_v33, %v525_v45 }
 0x170   :  { %v816_v53 = vadd.f32 %v814_v10, %v805_v24  ;;  %v825_v6 = vmul.f32 %v821_v38, %v525_v45  ;;  %v826_v32 = vmul.f32 %v822_v34, %v524_v14  ;;  %v817_v43 = vadd.f32 %v815_v20, %v806_v3 }
 0x171   :  { %v536_v2 = vadd.f32 %v534_v25, %v519_v40  ;;  %v535_v33 = vadd.f32 %v533_v22, %v518_v48  ;;  %v580_v56 = vperm.slane %v1142_v39, 0  ;;  %v855_v13 = vperm.slane %v1160_v42, 1  ;;  %v1164_v39 = vld [vmem:[%s2234_s3 + $0x42] ss:$8 sm:$0x3] }
 0x172   :  { %v555_v0 = vpop.permute.xlu0 %554  ;;  %v828_v41 = vadd.f32 %v826_v32, %v817_v43  ;;  %v865_v10 = vperm.slane %v1161_v47, 0  ;;  %v866_v14 = vperm.slane %v1161_v47, 1  ;;  %v876_v40 = vperm.slane %v1162_v5, 0 }
 0x173   :  { %v538_v44 = vpop.permute.xlu1 %537 }
 0x174   :  { %v541_v27 = vsel %vm91_vm2, %v538_v44, %v1799_v58  ;;  %v542_v12 = vsel %vm91_vm2, %v1799_v58, %v538_v44  ;;  %v869_v43 = vmul.f32 %v865_v10, %v1576_v9 }
 0x175   :  { %v550_v58 = vmul.f32 %v546_v17, %v542_v12  ;;  %v551_v57 = vmul.f32 %v547_v29, %v541_v27  ;;  %v836_v55 = vmul.f32 %v832_v7, %v542_v12  ;;  %v837_v28 = vmul.f32 %v833_v1, %v541_v27 }
 0x176   :  { %v827_v17 = vadd.f32 %v825_v6, %v816_v53  ;;  %v1145_v53 = vld [vmem:[%s2234_s3 + $0x17] ss:$8 sm:$0x3]  ;;  %v2242_v6 = vperm.slane %v1635_v26, 1 }
 0x177   :  { %v552_v1 = vadd.f32 %v550_v58, %v535_v33  ;;  %v553_v44 = vadd.f32 %v551_v57, %v536_v2  ;;  %v839_v61 = vadd.f32 %v837_v28, %v828_v41  ;;  %v634_v33 = vpop.permute.xlu2 %633  ;;  %v625_v42 = vperm.slane %v1145_v53, 0 }
 0x178   :  { %v838_v4 = vadd.f32 %v836_v55, %v827_v17  ;;  %v596_v32 = vmul.f32 %v2242_v6, %v1578_v15  ;;  %v1146_v55 = vld [vmem:[%s2234_s3 + $0x20] ss:$8 sm:$0x3]  ;;  %v898_v41 = vperm.slane %v1164_v39, 0  ;;  %v918_v6 = vstv %s1945_s2 }
 0x17a   :  { %v574_v51 = vpop.permute.xlu0 %573 }
 0x17b   :  { %v557_v16 = vpop.permute.xlu1 %556  ;;  %v575_v52 = vsel %vm137_vm4, %v572_v50, %v574_v51  ;;  %v576_v35 = vsel %vm137_vm4, %v574_v51, %v572_v50  ;;  %v877_v50 = vperm.slane %v1162_v5, 1  ;;  %v1163_v51 = vld [vmem:[%s2234_s3 + $0x41] ss:$8 sm:$0x3] }
 0x17c   :  { %v558_v38 = vsel %vm114_vm3, %v555_v0, %v557_v16  ;;  %v559_v34 = vsel %vm114_vm3, %v557_v16, %v555_v0  ;;  %v1144_v0 = vld [vmem:[%s2234_s3 + $0x16] ss:$8 sm:$0x3]  ;;  %v584_v62 = vmul.f32 %v580_v56, %v576_v35  ;;  %v585_v24 = vmul.f32 %v581_v30, %v575_v52 }
 0x17d   :  { %v567_v21 = vmul.f32 %v563_v23, %v559_v34  ;;  %v568_v29 = vmul.f32 %v564_v8, %v558_v38  ;;  %v847_v7 = vmul.f32 %v843_v49, %v559_v34  ;;  %v848_v54 = vmul.f32 %v844_v31, %v558_v38 }
 0x17e   :  { %v608_v63 = vperm.slane %v1144_v0, 0  ;;  %v609_v11 = vperm.slane %v1144_v0, 1  ;;  %v858_v45 = vmul.f32 %v854_v60, %v576_v35  ;;  %v859_v8 = vmul.f32 %v855_v13, %v575_v52 }
 0x17f   :  { %v569_v59 = vadd.f32 %v567_v21, %v552_v1  ;;  %v570_v46 = vadd.f32 %v568_v29, %v553_v44  ;;  %v849_v19 = vadd.f32 %v847_v7, %v838_v4  ;;  %v850_v23 = vadd.f32 %v848_v54, %v839_v61  ;;  %v1147_v44 = vld [vmem:[%s2234_s3 + $0x21] ss:$8 sm:$0x3] }
 0x180   :  { %v2241_v31 = vperm.slane %v1635_v26, 0  ;;  %v870_v16 = vmul.f32 %v866_v14, %v1578_v15  ;;  %v626_v26 = vperm.slane %v1145_v53, 1  ;;  %v887_v38 = vperm.slane %v1163_v51, 0 }
 0x181   :  { %v586_v27 = vadd.f32 %v584_v62, %v569_v59  ;;  %v587_v12 = vadd.f32 %v585_v24, %v570_v46  ;;  %v860_v25 = vadd.f32 %v858_v45, %v849_v19  ;;  %v861_v49 = vadd.f32 %v859_v8, %v850_v23  ;;  %v1165_v59 = vld [vmem:[%s2234_s3 + $0x43] ss:$8 sm:$0x3]  ;;  %v653_v8 = vpop.permute.xlu2 %652 }
 0x182   :  { %v617_v36 = vpop.permute.xlu0 %616  ;;  %v595_v22 = vmul.f32 %v2241_v31, %v1576_v9  ;;  %v888_v21 = vperm.slane %v1163_v51, 1  ;;  %v642_v7 = vperm.slane %v1146_v55, 0  ;;  %v899_v1 = vperm.slane %v1164_v39, 1 }
 0x183   :  { %v600_v20 = vpop.permute.xlu1 %599  ;;  %v598_v34 = vadd.f32 %v596_v32, %v587_v12  ;;  %v871_v17 = vadd.f32 %v869_v43, %v860_v25  ;;  %v872_v29 = vadd.f32 %v870_v16, %v861_v49  ;;  %v659_v19 = vperm.slane %v1147_v44, 0 }
 0x184   :  { %v603_v3 = vsel %vm178_vm5, %v600_v20, %v602_v18  ;;  %v604_v48 = vsel %vm178_vm5, %v602_v18, %v600_v20  ;;  %v597_v9 = vadd.f32 %v595_v22, %v586_v27  ;;  %v643_v18 = vperm.slane %v1146_v55, 1 }
 0x185   :  { %v612_v2 = vmul.f32 %v608_v63, %v603_v3  ;;  %v613_v58 = vmul.f32 %v609_v11, %v604_v48  ;;  %v880_v57 = vmul.f32 %v876_v40, %v603_v3  ;;  %v881_v28 = vmul.f32 %v877_v50, %v604_v48 }
 0x186   :  { %v660_v10 = vperm.slane %v1147_v44, 1  ;;  %v909_v62 = vperm.slane %v1165_v59, 0  ;;  %v910_v24 = vperm.slane %v1165_v59, 1  ;;  %v668_v32 = vstv %s1950_s21  ;;  %v1182_v44 = vld [vmem:[%s2236_s5 + $0x178] sm:$0xff]  ;;  %v711_v59 = vld [vmem:[%s2236_s5 + $0xb0] sm:$0xff] }
 0x187   :  { %v614_v30 = vadd.f32 %v612_v2, %v597_v9  ;;  %v615_v54 = vadd.f32 %v613_v58, %v598_v34  ;;  %v882_v47 = vadd.f32 %v880_v57, %v871_v17  ;;  %v883_v4 = vadd.f32 %v881_v28, %v872_v29  ;;  %v704_v17 = vld [vmem:[%s2236_s5 + $0x78] sm:$0xff]  ;;  %v719_v29 = vld [vmem:[%s2236_s5 + $0xf0] sm:$0xff]  ;;  %972 = vmatpush.msra.mxu0 %v1182_v44 }
 0x188   :  { %1012 = vmatpush.msra.mxu2 %v704_v17  ;;  %v1191_v17 = vld [vmem:[%s2236_s5 + $0x1c0] sm:$0xff]  ;;  %v1185_v44 = vld [vmem:[%s2236_s5 + $0x190] sm:$0xff] }
 0x18a   :  { %v636_v15 = vpop.permute.xlu0 %635 }
 0x18b   :  { %v619_v56 = vpop.permute.xlu1 %618  ;;  %v638_v60 = vsel %vm224_vm7, %v636_v15, %v634_v33  ;;  %v637_v46 = vsel %vm224_vm7, %v634_v33, %v636_v15  ;;  %v720_v15 = vld [vmem:[%s2236_s5 + $0xf8] sm:$0xff] }
 0x18c   :  { %v620_v0 = vsel %vm201_vm6, %v617_v36, %v619_v56  ;;  %v621_v61 = vsel %vm201_vm6, %v619_v56, %v617_v36  ;;  %v647_v14 = vmul.f32 %v643_v18, %v638_v60  ;;  %v903_v20 = vmul.f32 %v899_v1, %v638_v60  ;;  %1032 = vmatpush.msra.mxu3 %v720_v15  ;;  %v718_v18 = vld [vmem:[%s2236_s5 + $0xe8] sm:$0xff]  ;;  %v717_v56 = vld [vmem:[%s2236_s5 + $0xe0] sm:$0xff]  ;;  %v715_v1 = vld [vmem:[%s2236_s5 + $0xd0] sm:$0xff] }
 0x18d   :  { %v629_v13 = vmul.f32 %v625_v42, %v620_v0  ;;  %v630_v52 = vmul.f32 %v626_v26, %v621_v61  ;;  %v891_v35 = vmul.f32 %v887_v38, %v620_v0  ;;  %v892_v5 = vmul.f32 %v888_v21, %v621_v61  ;;  %v703_v21 = vld [vmem:[%s2236_s5 + $0x70] sm:$0xff]  ;;  %v698_v60 = vld [vmem:[%s2236_s5 + $0x48] sm:$0xff]  ;;  %v697_v61 = vld [vmem:[%s2236_s5 + $0x40] sm:$0xff] }
 0x18e   :  { %v646_v45 = vmul.f32 %v642_v7, %v637_v46  ;;  %v902_v40 = vmul.f32 %v898_v41, %v637_v46  ;;  %v702_v7 = vld [vmem:[%s2236_s5 + $0x68] sm:$0xff]  ;;  %1013 = vmatpush.msra.mxu2 %v703_v21  ;;  %1033 = vmatpush.msra.mxu3 %v719_v29  ;;  %v701_v41 = vld [vmem:[%s2236_s5 + $0x60] sm:$0xff]  ;;  %v1174_v15 = vld [vmem:[%s2236_s5 + $0x138] sm:$0xff] }
 0x18f   :  { %v631_v23 = vadd.f32 %v629_v13, %v614_v30  ;;  %v632_v63 = vadd.f32 %v630_v52, %v615_v54  ;;  %v893_v36 = vadd.f32 %v891_v35, %v882_v47  ;;  %v894_v11 = vadd.f32 %v892_v5, %v883_v4  ;;  %v700_v30 = vld [vmem:[%s2236_s5 + $0x58] sm:$0xff]  ;;  %v699_v47 = vld [vmem:[%s2236_s5 + $0x50] sm:$0xff]  ;;  %v714_v0 = vld [vmem:[%s2236_s5 + $0xc8] sm:$0xff] }
 0x190   :  { %1014 = vmatpush.msra.mxu2 %v702_v7  ;;  %1034 = vmatpush.msra.mxu3 %v718_v18  ;;  %v716_v54 = vld [vmem:[%s2236_s5 + $0xd8] sm:$0xff]  ;;  %v713_v13 = vld [vmem:[%s2236_s5 + $0xc0] sm:$0xff]  ;;  %v695_v5 = vld [vmem:[%s2236_s5 + $0x30] sm:$0xff] }
 0x191   :  { %v649_v50 = vadd.f32 %v647_v14, %v632_v63  ;;  %v905_v3 = vadd.f32 %v903_v20, %v894_v11  ;;  %v648_v27 = vadd.f32 %v646_v45, %v631_v23  ;;  %v904_v53 = vadd.f32 %v902_v40, %v893_v36  ;;  %v1198_v4 = vld [vmem:[%s2236_s5 + $0x1f8] sm:$0xff]  ;;  %v694_v46 = vld [vmem:[%s2236_s5 + $0x28] sm:$0xff]  ;;  %v709_v23 = vld [vmem:[%s2236_s5 + $0xa0] sm:$0xff] }
 0x192   :  { %1015 = vmatpush.msra.mxu2 %v701_v41  ;;  %1035 = vmatpush.msra.mxu3 %v717_v56  ;;  %v696_v52 = vld [vmem:[%s2236_s5 + $0x38] sm:$0xff]  ;;  %v1173_v29 = vld [vmem:[%s2236_s5 + $0x130] sm:$0xff]  ;;  %v1172_v18 = vld [vmem:[%s2236_s5 + $0x128] sm:$0xff] }
 0x193   :  { %v651_v48 = vpop.permute.xlu1 %650  ;;  %992 = vmatpush.msra.mxu1 %v1198_v4  ;;  %v712_v35 = vld [vmem:[%s2236_s5 + $0xb8] sm:$0xff]  ;;  %v1189_v7 = vld [vmem:[%s2236_s5 + $0x1b0] sm:$0xff]  ;;  %v1188_v41 = vld [vmem:[%s2236_s5 + $0x1a8] sm:$0xff] }
 0x194   :  { %v654_v12 = vsel %vm247_vm8, %v651_v48, %v653_v8  ;;  %v655_v25 = vsel %vm247_vm8, %v653_v8, %v651_v48  ;;  %1016 = vmatpush.msra.mxu2 %v700_v30  ;;  %1036 = vmatpush.msra.mxu3 %v716_v54  ;;  %v692_v63 = vld [vmem:[%s2236_s5 + $0x18] sm:$0xff]  ;;  %v1171_v56 = vld [vmem:[%s2236_s5 + $0x120] sm:$0xff]  ;;  %v1168_v4 = vld [vmem:[%s2236_s5 + $0x108] sm:$0xff] }
 0x195   :  { %v663_v51 = vmul.f32 %v659_v19, %v654_v12  ;;  %v664_v49 = vmul.f32 %v660_v10, %v655_v25  ;;  %v913_v31 = vmul.f32 %v909_v62, %v654_v12  ;;  %v914_v22 = vmul.f32 %v910_v24, %v655_v25  ;;  %v710_v19 = vld [vmem:[%s2236_s5 + $0xa8] sm:$0xff]  ;;  %v693_v10 = vld [vmem:[%s2236_s5 + $0x20] sm:$0xff]  ;;  %v708_v36 = vld [vmem:[%s2236_s5 + $0x98] sm:$0xff] }
 0x196   :  { %1017 = vmatpush.msra.mxu2 %v699_v47  ;;  %1037 = vmatpush.msra.mxu3 %v715_v1  ;;  %v1190_v21 = vld [vmem:[%s2236_s5 + $0x1b8] sm:$0xff]  ;;  %v1187_v30 = vld [vmem:[%s2236_s5 + $0x1a0] sm:$0xff]  ;;  %v1169_v1 = vld [vmem:[%s2236_s5 + $0x110] sm:$0xff] }
 0x197   :  { %v665_v43 = vadd.f32 %v663_v51, %v648_v27  ;;  %v666_v16 = vadd.f32 %v664_v49, %v649_v50  ;;  %v915_v2 = vadd.f32 %v913_v31, %v904_v53  ;;  %v916_v58 = vadd.f32 %v914_v22, %v905_v3  ;;  %v1181_v49 = vld [vmem:[%s2236_s5 + $0x170] sm:$0xff]  ;;  %v1170_v54 = vld [vmem:[%s2236_s5 + $0x118] sm:$0xff] }
 0x198   :  { %1018 = vmatpush.msra.mxu2 %v698_v60  ;;  %1038 = vmatpush.msra.mxu3 %v714_v0  ;;  %v1197_v31 = vld [vmem:[%s2236_s5 + $0x1f0] sm:$0xff]  ;;  %v1186_v47 = vld [vmem:[%s2236_s5 + $0x198] sm:$0xff]  ;;  %v1184_v60 = vld [vmem:[%s2236_s5 + $0x188] sm:$0xff] }
 0x199   :  { %v1960_v57 = vadd.f32 %v918_v6, %v915_v2  ;;  %v1962_v55 = vadd.f32 %v918_v6, %v916_v58  ;;  %v1964_v39 = vadd.f32 %v668_v32, %v665_v43  ;;  %v1966_v33 = vadd.f32 %v668_v32, %v666_v16  ;;  %v691_v22 = vld [vmem:[%s2236_s5 + $0x10] sm:$0xff]  ;;  %973 = vmatpush.msra.mxu0 %v1181_v49  ;;  %v1180_v32 = vld [vmem:[%s2236_s5 + $0x168] sm:$0xff]  ;;  %v1179_v58 = vld [vmem:[%s2236_s5 + $0x160] sm:$0xff] }
 0x19a   :  { %1019 = vmatpush.msra.mxu2 %v697_v61  ;;  %1039 = vmatpush.msra.mxu3 %v713_v13  ;;  %v707_v6 = vld [vmem:[%s2236_s5 + $0x90] sm:$0xff]  ;;  %v1196_v43 = vld [vmem:[%s2236_s5 + $0x1e8] sm:$0xff]  ;;  %v1167_v0 = vld [vmem:[%s2236_s5 + $0x100] sm:$0xff] }
 0x19b   :  { %v921_v28 = vmax.f32 %v1960_v57, 0.0  ;;  %v922_v42 = vmax.f32 %v1962_v55, 0.0  ;;  %v671_v26 = vmax.f32 %v1964_v39, 0.0  ;;  %v672_v38 = vmax.f32 %v1966_v33, 0.0  ;;  %993 = vmatpush.msra.mxu1 %v1197_v31  ;;  %v690_v16 = vld [vmem:[%s2236_s5 + $0x8] sm:$0xff]  ;;  %974 = vmatpush.msra.mxu0 %v1180_v32  ;;  %v1195_v57 = vld [vmem:[%s2236_s5 + $0x1e0] sm:$0xff] }
 0x19c   :  { %1020 = vmatpush.msra.mxu2 %v696_v52  ;;  %1040 = vmatpush.msra.mxu3 %v712_v35  ;;  %v706_v2 = vld [vmem:[%s2236_s5 + $0x88] sm:$0xff]  ;;  %v689_v55 = vld [vmem:[%s2236_s5] sm:$0xff]  ;;  %v1178_v33 = vld [vmem:[%s2236_s5 + $0x158] sm:$0xff] }
 0x19d   :  { %v1217_v34 = vpack.i.bf16 %v922_v42, %v921_v28  ;;  %v1212_v9 = vpack.i.bf16 %v672_v38, %v671_v26  ;;  %994 = vmatpush.msra.mxu1 %v1196_v43  ;;  %v705_v39 = vld [vmem:[%s2236_s5 + $0x80] sm:$0xff]  ;;  %975 = vmatpush.msra.mxu0 %v1179_v58 }
 0x19e   :  { %1021 = vmatpush.msra.mxu2 %v695_v5  ;;  %1041 = vmatpush.msra.mxu3 %v711_v59  ;;  %v1183_v61 = vld [vmem:[%s2236_s5 + $0x180] sm:$0xff] }
 0x19f   :  { %1218 = vrot.lane.b32.xlu1 %v1217_v34, %s1296_s26  ;;  %1213 = vrot.lane.b32.xlu0 %v1212_v9, %s1296_s26  ;;  %v1192_v34 = vld [vmem:[%s2236_s5 + $0x1c8] sm:$0xff]  ;;  %v1175_v9 = vld [vmem:[%s2236_s5 + $0x140] sm:$0xff] }
 0x1a0   :  { %1022 = vmatpush.msra.mxu2 %v694_v46  ;;  %1042 = vmatpush.msra.mxu3 %v710_v19 }
 0x1a1   :  { %995 = vmatpush.msra.mxu1 %v1195_v57  ;;  %976 = vmatpush.msra.mxu0 %v1178_v33 }
 0x1a2   :  { %1023 = vmatpush.msra.mxu2 %v693_v10  ;;  %1043 = vmatpush.msra.mxu3 %v709_v23 }
 0x1a4   :  { %1024 = vmatpush.msra.mxu2 %v692_v63  ;;  %1044 = vmatpush.msra.mxu3 %v708_v36 }
 0x1a6   :  { %1025 = vmatpush.msra.mxu2 %v691_v22  ;;  %1045 = vmatpush.msra.mxu3 %v707_v6 }
 0x1a8   :  { %1026 = vmatpush.msra.mxu2 %v690_v16  ;;  %1046 = vmatpush.msra.mxu3 %v706_v2 }
 0x1aa   :  { %1027 = vmatpush.msra.mxu2 %v689_v55  ;;  %1047 = vmatpush.msra.mxu3 %v705_v39 }
 0x211   :  { %v1219_v11 = vpop.permute.xlu1 %1218  ;;  %v1214_v14 = vpop.permute.xlu0 %1213 }
 0x212   :  { %v1221_v20 = vunpack.i.h.bf16 %v1219_v11  ;;  %v1220_v62 = vunpack.i.l.bf16 %v1219_v11  ;;  %v1216_v24 = vunpack.i.h.bf16 %v1214_v14  ;;  %v1215_v45 = vunpack.i.l.bf16 %v1214_v14 }
 0x214   :  { %v927_v40 = vsel %vm224_vm7, %v1220_v62, %v1221_v20  ;;  %v928_v8 = vsel %vm224_vm7, %v1221_v20, %v1220_v62  ;;  %v677_v50 = vsel %vm224_vm7, %v1215_v45, %v1216_v24  ;;  %v678_v3 = vsel %vm224_vm7, %v1216_v24, %v1215_v45  ;;  %v1059_v62 = vld [vmem:[%s2238_s7 + $0x8] sm:$0xf]  ;;  %v1058_v24 = vld [vmem:[%s2238_s7] sm:$0xff]  ;;  %s1298_s7 = smov [#allocation7]  }
 0x215   :  { %v2076_v48 = vmax.f32 %v921_v28, %v927_v40  ;;  %v2080_v27 = vmax.f32 %v922_v42, %v928_v8  ;;  %v2084_v12 = vmax.f32 %v671_v26, %v677_v50  ;;  %v2088_v25 = vmax.f32 %v672_v38, %v678_v3  ;;  %v1194_v28 = vld [vmem:[%s2236_s5 + $0x1d8] sm:$0xff]  ;;  %v1177_v42 = vld [vmem:[%s2236_s5 + $0x150] sm:$0xff]  ;;  %v1176_v38 = vld [vmem:[%s2236_s5 + $0x148] sm:$0xff]  ;;  %s1100_s13 = sshll.u32 %s1298_s7, 4  ;;  %s1101_s13 = int_to_ptr.vmem [resolvable:$true] %s1100_s13 }
 0x216   :  { %v1193_v26 = vld [vmem:[%s2236_s5 + $0x1d0] sm:$0xff]  ;;  %996 = vmatpush.msra.mxu1 %v1194_v28  ;;  %977 = vmatpush.msra.mxu0 %v1177_v42  ;;  %v1232_v3 = vld [vmem:[%s2237_s6] ss:$0 sm:$0xff] }
 0x217   :  { %v1227_v53 = vpack.i.bf16 %v2080_v27, %v2076_v48  ;;  %v1222_v51 = vpack.i.bf16 %v2088_v25, %v2084_v12 }
 0x218   :  { %997 = vmatpush.msra.mxu1 %v1193_v26  ;;  %978 = vmatpush.msra.mxu0 %v1176_v38 }
 0x219   :  { %1228 = vrot.lane.b32.xlu0 %v1227_v53, %s1294_s22  ;;  %1223 = vrot.lane.b32.xlu2 %v1222_v51, %s1294_s22  ;;  %v1233_v53 = vld [vmem:[%s2239_s8] ss:$0 sm:$0xff] }
 0x21a   :  { %998 = vmatpush.msra.mxu1 %v1192_v34  ;;  %979 = vmatpush.msra.mxu0 %v1175_v9 }
 0x21c   :  { %999 = vmatpush.msra.mxu1 %v1191_v17  ;;  %980 = vmatpush.msra.mxu0 %v1174_v15 }
 0x21e   :  { %1000 = vmatpush.msra.mxu1 %v1190_v21  ;;  %981 = vmatpush.msra.mxu0 %v1173_v29 }
 0x220   :  { %1001 = vmatpush.msra.mxu1 %v1189_v7  ;;  %982 = vmatpush.msra.mxu0 %v1172_v18 }
 0x222   :  { %1002 = vmatpush.msra.mxu1 %v1188_v41  ;;  %983 = vmatpush.msra.mxu0 %v1171_v56 }
 0x224   :  { %1003 = vmatpush.msra.mxu1 %v1187_v30  ;;  %984 = vmatpush.msra.mxu0 %v1170_v54 }
 0x226   :  { %1004 = vmatpush.msra.mxu1 %v1186_v47  ;;  %985 = vmatpush.msra.mxu0 %v1169_v1 }
 0x228   :  { %1005 = vmatpush.msra.mxu1 %v1185_v44  ;;  %986 = vmatpush.msra.mxu0 %v1168_v4 }
 0x22a   :  { %1006 = vmatpush.msra.mxu1 %v1184_v60  ;;  %987 = vmatpush.msra.mxu0 %v1167_v0 }
 0x22c   :  { %1007 = vmatpush.msra.mxu1 %v1183_v61  ;;  %1199 = vmatpush.msk.msrb.mxu0 %vm1068_vm9, %v1059_v62 }
 0x22e   :  { %1087 = vmatpush.msrb.mxu0 %v1058_v24 }
 0x273   :  { %v1224_v13 = vpop.permute.xlu2 %1223 }
 0x274   :  { %v1226_v52 = vunpack.i.h.bf16 %v1224_v13  ;;  %v1225_v35 = vunpack.i.l.bf16 %v1224_v13 }
 0x276   :  { %v685_v5 = vsel %vm178_vm5, %v1225_v35, %v1226_v52  ;;  %v686_v59 = vsel %vm178_vm5, %v1226_v52, %v1225_v35 }
 0x277   :  { %v687_v46 = vmax.f32 %v2084_v12, %v685_v5  ;;  %v688_v19 = vmax.f32 %v2088_v25, %v686_v59 }
 0x279   :  { %1028 = vmatmul.f32.vlgmr.msra.gmra.mxu2 %v687_v46  ;;  %1048 = vmatmul.f32.vlgmr.msra.gmra.mxu3 %v688_v19 }
 0x28b   :  { %v1229_v10 = vpop.permute.xlu0 %1228 }
 0x28c   :  { %v1231_v23 = vunpack.i.h.bf16 %v1229_v10  ;;  %v1230_v63 = vunpack.i.l.bf16 %v1229_v10 }
 0x28e   :  { %v935_v36 = vsel %vm178_vm5, %v1230_v63, %v1231_v23  ;;  %v936_v11 = vsel %vm178_vm5, %v1231_v23, %v1230_v63 }
 0x28f   :  { %v937_v14 = vmax.f32 %v2076_v48, %v935_v36  ;;  %v938_v20 = vmax.f32 %v2080_v27, %v936_v11 }
 0x291   :  { %988 = vmatmul.f32.vlgmr.msra.gmra.mxu0 %v937_v14  ;;  %1008 = vmatmul.f32.vlgmr.msra.gmra.mxu1 %v938_v20 }
 0x2fc   :  { %v1029_v8 = vpop.f32.mrf.mxu2  ;;  %v1049_v48 = vpop.f32.mrf.mxu3 }
 0x30e   :  { %v989_v45 = vpop.f32.mrf.mxu0  ;;  %v1009_v37 = vpop.f32.mrf.mxu1 }
 0x30f   :  { %v1010_v40 = vadd.f32 %v1009_v37, %v989_v45 }
 0x311   :  { %v1030_v50 = vadd.f32 %v1029_v8, %v1010_v40 }
 0x313   :  { %v1050_v27 = vadd.f32 %v1049_v48, %v1030_v50 }
 0x315   :  { %v1056_v12 = vadd.f32 %v1232_v3, %v1050_v27 }
 0x317   :  { %v1057_v25 = vmax.f32 %v1056_v12, 0.0 }
 0x319   :  { %1200 = vmatmul.msk.f32.vlgmr.msrb.gmra.mxu0 %vm1064_vm10, %v1057_v25 }
 0x396   :  { %v1089_v51 = vpop.f32.mrf.mxu0 }
 0x397   :  { %v1090_v49 = vadd.f32 %v1233_v53, %v1089_v51 }
 0x399   :  { %v1092_v31 = vmax.f32 %v1090_v49, 0.0 }
 0x39b   :  { %1094 = vst.msk [vmem:[#allocation7] sm:$0x3] %vm1093_vm11, %v1092_v31 }
 0x39c   :  { %1105 = dma.vmem_to_hbm [thread:$0]  %s1101_s13, 32, %s1103_s15, [#allocation3]  }
 0x39d   :  { %1286 = dma.done.wait [#allocation3], 32  }
 0x39e   :  { %1287 = vsyncadd [#allocation3], 4294967264 }
 0x39f   :  { %1110 = vsyncpa [#allocation3], 1 }
 0x3a0   :  { %1111 = vsyncpa [#allocation4], 1 }
 0x3a1   :  { %1112 = vsyncpa [#allocation6], 1 }

</bundles_post_ra>
